<compile_context>
chip_gen: v6e
topology: v6e:2x2x1
jax: 0.10.0
libtpu: 0.0.40
codegen_flags: <defaults>
</compile_context>

<pallas_src>
from functools import partial

import numpy as np
import jax
import jax.numpy as jnp
from jax.scipy.special import erf
from jax.experimental import pallas as pl
from jax.experimental.pallas import tpu as pltpu

HIDDEN = 128
_INV_SQRT2 = 0.7071067811865476
MATMUL_DTYPE = jnp.bfloat16            # MXU operand dtype; accumulation stays f32
MAX_ROW_TILE = 1024
_FALLBACK_VMEM_LIMIT = 48 * 1024 * 1024   # safe on every generation (v7x: 64 MiB)


def _round_up(v, m):
    return (v + m - 1) // m * m


def _cdiv(a, b):
    return -(-a // b)


def _gelu_exact(x):
    # Exact (erf-based) GELU in f32, matching PyTorch's default nn.GELU.
    # TODO(synk): on v6e/v7x the erf polynomial is likely the binding VALU slot;
    # the tanh approximation (EUP) or a bf16 GELU would be faster but changes
    # numerics, so it is not applied here.
    return 0.5 * x * (1.0 + erf(x * _INV_SQRT2))


# ----------------------------------------------------------------------------
# Hardware probes (run eagerly, cached)
# ----------------------------------------------------------------------------
_VMEM_LIMIT_CACHE = None


def _vmem_limit():
    """Generation-aware scoped-VMEM budget."""
    global _VMEM_LIMIT_CACHE
    if _VMEM_LIMIT_CACHE is None:
        try:
            cap = int(pltpu.get_tpu_info().vmem_capacity_bytes)
            _VMEM_LIMIT_CACHE = min(int(0.75 * cap), 100 * 1024 * 1024)
        except Exception:
            _VMEM_LIMIT_CACHE = _FALLBACK_VMEM_LIMIT
    return _VMEM_LIMIT_CACHE


_BUFFERED_CACHE = None


def _buffered_weights_supported():
    """Probe whether BlockSpec(pipeline_mode=pl.Buffered(1)) compiles and runs
    correctly on this jax/libtpu.  If so, constant-index (resident) weight
    blocks are single-buffered, halving their VMEM footprint."""
    global _BUFFERED_CACHE
    if _BUFFERED_CACHE is not None:
        return _BUFFERED_CACHE
    try:
        def k(x_ref, w_ref, o_ref):
            o_ref[...] = x_ref[...] + w_ref[...]

        x = jnp.arange(16 * 128, dtype=jnp.float32).reshape(16, 128)
        w = jnp.ones((8, 128), jnp.float32)
        out = pl.pallas_call(
            k,
            out_shape=jax.ShapeDtypeStruct((16, 128), jnp.float32),
            grid=(2,),
            in_specs=[pl.BlockSpec((8, 128), lambda i: (i, 0)),
                      pl.BlockSpec((8, 128), lambda i: (0, 0),
                                   pipeline_mode=pl.Buffered(1))],
            out_specs=pl.BlockSpec((8, 128), lambda i: (i, 0)),
        )(x, w)
        _BUFFERED_CACHE = bool(np.allclose(np.asarray(jax.block_until_ready(out)),
                                           np.asarray(x) + 1.0))
    except Exception:
        _BUFFERED_CACHE = False
    return _BUFFERED_CACHE


# ----------------------------------------------------------------------------
# Pallas kernels
# ----------------------------------------------------------------------------
def _mlp_kernel(n_layers, x_ref, *refs):
    """n_layers x Linear with GELU after every layer except the last.
    refs = (w0, b0, ..., w_{n-1}, b_{n-1}, o_ref, acc_ref).
    The first layer is accumulated over the K grid axis into acc_ref (f32);
    at the last K step the remaining layers run and the bf16 output is stored.
    Matmuls use bf16 operands on the MXU with f32 accumulation; bias add + GELU
    are computed in f32."""
    o_ref = refs[2 * n_layers]
    acc_ref = refs[2 * n_layers + 1]
    k = pl.program_id(1)

    @pl.when(k == 0)
    def _():
        acc_ref[...] = jnp.zeros_like(acc_ref)

    w0 = refs[0][...]
    acc_ref[...] += jnp.dot(x_ref[...], w0, preferred_element_type=jnp.float32)

    @pl.when(k == pl.num_programs(1) - 1)
    def _():
        h = acc_ref[...] + refs[1][...]
        if n_layers > 1:
            h = _gelu_exact(h)
        for li in range(1, n_layers):
            w = refs[2 * li][...]
            b = refs[2 * li + 1][...]
            z = jnp.dot(h.astype(w.dtype), w, preferred_element_type=jnp.float32) + b
            h = _gelu_exact(z) if li < n_layers - 1 else z
        o_ref[...] = h.astype(o_ref.dtype)


def _combine_kernel(xb_ref, gt_ref, b_ref, o_ref):
    """One (channel, N-tile, B-tile) block of einsum('bci,nci->bnc') + bias.
    xb_ref: [TB, H] branch block, gt_ref: [TN, H] trunk block (both already the
    channel slice picked by the BlockSpec index_map), b_ref: [C] bias in SMEM,
    o_ref: [1, TB, TN] lane-dense f32 output block."""
    # NT dot_general (contracting dim 1 of both operands).  If the XLU transpose
    # of gt shows up on the critical path, emit the trunk output pre-transposed.
    acc = jax.lax.dot_general(
        xb_ref[...], gt_ref[...],
        dimension_numbers=(((1,), (1,)), ((), ())),
        preferred_element_type=jnp.float32)
    o_ref[0] = acc + b_ref[pl.program_id(0)]


# ----------------------------------------------------------------------------
# Tiling planner
# ----------------------------------------------------------------------------
def _largest_dividing_tile_k(in_pad, max_tile_k):
    """Largest multiple of 128 that divides in_pad and is <= max_tile_k."""
    q = in_pad // 128
    dmax = max(1, min(q, max_tile_k // 128))
    best = 1
    for d in range(1, dmax + 1):
        if q % d == 0:
            best = d
    return 128 * best


def _plan_mlp(rows, in_pad, out_dim, vmem_limit, single_buffer_weights):
    """Pick (tile_m, tile_k) for one MLP pallas_call against the VMEM budget."""
    wf = 1 if single_buffer_weights else 2
    budget = int(0.70 * vmem_limit)

    # Resident layers 1..n-1 (bf16 weights, f32 biases).
    resident = wf * ((3 * HIDDEN * HIDDEN + HIDDEN * out_dim) * 2
                     + (4 * HIDDEN + out_dim) * 4)
    w0_full = in_pad * HIDDEN * 2
    if wf * w0_full <= budget // 2:
        tile_k = in_pad                        # whole first-layer weight resident
        resident += wf * w0_full
    else:
        # K-tiling fallback: stream the huge first-layer weight in
        # (tile_k x 128) blocks; those blocks are double-buffered.
        max_tk = max(128, (budget // 4) // (2 * HIDDEN * 2) // 128 * 128)
        tile_k = _largest_dividing_tile_k(in_pad, max_tk)
        resident += 2 * tile_k * HIDDEN * 2

    def fits(tm):
        x_buf = 2 * tm * tile_k * 2            # bf16 input tile, double-buffered
        o_buf = 2 * tm * out_dim * 2           # bf16 output tile, double-buffered
        acc = tm * HIDDEN * 4                  # f32 accumulator scratch
        interm = 6 * tm * max(HIDDEN, out_dim) * 4   # f32 temporaries headroom
        return resident + x_buf + o_buf + acc + interm <= budget

    cap = min(MAX_ROW_TILE, _round_up(rows, 16))
    tile_m = 16
    for cand in sorted({cap, 1024, 768, 512, 384, 256, 192, 128, 96, 64, 48, 32, 16},
                       reverse=True):
        if cand <= cap and cand % 16 == 0 and fits(cand):
            tile_m = cand
            break

    # Prefer >= 2 row tiles so the "parallel" row axis can shard across v7x's
    # two TensorCores; negligible per-step cost on v5e/v6e.
    if rows >= 32 and _round_up(rows, tile_m) == tile_m:
        tile_m = _round_up(_cdiv(rows, 2), 16)
    return tile_m, tile_k


# ----------------------------------------------------------------------------
# pallas_call wrappers
# ----------------------------------------------------------------------------
def mlp_pallas(x_pad, weights, biases, tile_m, tile_k, use_buffered):
    """x_pad: [M, F] bf16 (M % tile_m == 0, F % tile_k == 0).  weights[i]:
    [in, out] bf16 (pre-transposed vs PyTorch Linear), biases[i]: [1, out] f32."""
    M, F = x_pad.shape
    n_layers = len(weights)
    out_dim = weights[-1].shape[1]
    nk = F // tile_k

    def const_spec(shape):
        # Constant block index -> stays VMEM-resident; single-buffer when supported.
        if use_buffered:
            return pl.BlockSpec(shape, lambda i, k: (0, 0),
                                pipeline_mode=pl.Buffered(1))
        return pl.BlockSpec(shape, lambda i, k: (0, 0))

    args = [x_pad]
    in_specs = [pl.BlockSpec((tile_m, tile_k), lambda i, k: (i, k))]

    w0, b0 = weights[0], biases[0]
    if nk > 1:
        in_specs.append(pl.BlockSpec((tile_k, HIDDEN), lambda i, k: (k, 0)))
    else:
        in_specs.append(const_spec(w0.shape))
    in_specs.append(const_spec(b0.shape))
    args += [w0, b0]
    for w, b in zip(weights[1:], biases[1:]):
        in_specs += [const_spec(w.shape), const_spec(b.shape)]
        args += [w, b]

    return pl.pallas_call(
        partial(_mlp_kernel, n_layers),
        out_shape=jax.ShapeDtypeStruct((M, out_dim), MATMUL_DTYPE),
        grid=(M // tile_m, nk),
        in_specs=in_specs,
        out_specs=pl.BlockSpec((tile_m, out_dim), lambda i, k: (i, 0)),
        scratch_shapes=[pltpu.VMEM((tile_m, HIDDEN), jnp.float32)],
        compiler_params=pltpu.CompilerParams(
            dimension_semantics=("parallel", "arbitrary"),
            vmem_limit_bytes=_vmem_limit()),
    )(*args)


def combine_pallas(xb, gt, bias, C, H, tile_b, tile_n):
    """xb: [Bp, C*H] bf16, gt: [Np, C*H] bf16, bias: [C] f32.
    Returns [C, Bp, Np] f32 (lane-dense along Np)."""
    Bp = xb.shape[0]
    Np = gt.shape[0]
    return pl.pallas_call(
        _combine_kernel,
        out_shape=jax.ShapeDtypeStruct((C, Bp, Np), jnp.float32),
        # B innermost: stream the small branch tile, keep the (large) basis tile
        # resident across B steps (the pipeliner skips re-DMA on unchanged index).
        grid=(C, Np // tile_n, Bp // tile_b),
        in_specs=[
            pl.BlockSpec((tile_b, H), lambda c, j, i: (i, c)),   # channel slice via index_map
            pl.BlockSpec((tile_n, H), lambda c, j, i: (j, c)),
            pl.BlockSpec(memory_space=pltpu.MemorySpace.SMEM),   # per-channel bias
        ],
        out_specs=pl.BlockSpec((1, tile_b, tile_n), lambda c, j, i: (c, i, j)),
        compiler_params=pltpu.CompilerParams(
            dimension_semantics=("parallel", "parallel", "parallel"),
            vmem_limit_bytes=_vmem_limit()),
    )(xb, gt, bias)


# ----------------------------------------------------------------------------
# Parameter initialization (Glorot-normal weights; PyTorch uses zero biases but
# small random biases better exercise the bias-add paths in the demo)
# ----------------------------------------------------------------------------
def _glorot_normal(key, fan_in, fan_out):
    std = (2.0 / (fan_in + fan_out)) ** 0.5
    return jax.random.normal(key, (fan_in, fan_out), jnp.float32) * std


def _init_mlp(key, in_dim, hidden, out_dim, n_hidden=4, bias_scale=0.0):
    sizes = [in_dim] + [hidden] * n_hidden + [out_dim]
    Ws, bs = [], []
    for i in range(1, len(sizes)):
        key, kw, kb = jax.random.split(key, 3)
        Ws.append(_glorot_normal(kw, sizes[i - 1], sizes[i]))
        bs.append(bias_scale * jax.random.normal(kb, (sizes[i],), jnp.float32))
    return Ws, bs


def init_densedon3d_params(key, size, query_dim, time_step, in_channel_branch,
                           out_channel, num_layers, bias_scale=0.0):
    in_branch = in_channel_branch * size ** 2 * time_step
    out_bt = HIDDEN * out_channel
    keys = jax.random.split(key, num_layers + 2)
    return {
        "branch": _init_mlp(keys[0], in_branch, HIDDEN, out_bt, bias_scale=bias_scale),
        # trunk_list[i > 0] consumes the running `basis` (width i*128*out_channel),
        # as DenseDON3D.forward does.
        "trunk": [
            _init_mlp(keys[1 + i], query_dim if i == 0 else i * out_bt,
                      HIDDEN, out_bt, bias_scale=bias_scale)
            for i in range(num_layers)
        ],
        "b": bias_scale * jax.random.normal(keys[-1], (out_channel,), jnp.float32),
    }


def prepare_params(params):
    """One-time preprocessing outside jit: zero-pad each MLP's first-layer input
    width to a multiple of 128 and cast matmul weights to bf16."""
    def prep_mlp(Ws, bs):
        W0 = Ws[0]
        f_pad = _round_up(W0.shape[0], 128)
        W0p = jnp.pad(W0, ((0, f_pad - W0.shape[0]), (0, 0)))
        Wp = [W0p.astype(MATMUL_DTYPE)] + [w.astype(MATMUL_DTYPE) for w in Ws[1:]]
        bp = [b.reshape(1, -1).astype(jnp.float32) for b in bs]
        return Wp, bp

    return {
        "branch": prep_mlp(*params["branch"]),
        "trunk": [prep_mlp(*p) for p in params["trunk"]],
        "b": params["b"].astype(jnp.float32),
    }


# ----------------------------------------------------------------------------
# DenseDON3D forward (Pallas) and pure-JAX reference
# ----------------------------------------------------------------------------
def _pad_rows(a, target_rows):
    r = a.shape[0]
    if r == target_rows:
        return a
    if r > target_rows:
        return a[:target_rows]
    return jnp.pad(a, ((0, target_rows - r), (0, 0)))


def densedon3d_pallas(prep, x, grid, *, query_dim):
    B = x.shape[0]
    C = prep["b"].shape[0]
    g = grid[0].reshape(-1, query_dim).astype(jnp.float32)
    N = g.shape[0]
    use_buf = _buffered_weights_supported()
    vmem = _vmem_limit()

    def run_mlp(mlp, inp):
        Ws, bs = mlp
        rows, feats = inp.shape
        in_pad = Ws[0].shape[0]
        out_dim = Ws[-1].shape[1]
        tile_m, tile_k = _plan_mlp(rows, in_pad, out_dim, vmem, use_buf)
        rows_pad = _round_up(rows, tile_m)
        inp_p = jnp.pad(inp.astype(MATMUL_DTYPE),
                        ((0, rows_pad - rows), (0, in_pad - feats)))
        return mlp_pallas(inp_p, Ws, bs, tile_m, tile_k, use_buf)

    # branch network:  x.reshape(B, -1) -> [Bp, 128*C]
    # TODO(synk): the PyTorch forward calls self.branch, which __init__ never
    # defines (only branch_list); we use branch_list[0] as the intended module.
    branch_out = run_mlp(prep["branch"], x.reshape(B, -1))

    # trunk network, dense cascade:  basis grows by concatenation.
    basis = run_mlp(prep["trunk"][0], g)
    for i in range(1, len(prep["trunk"])):
        # TODO(synk): for num_layers > 1 the reference forward is not self-consistent
        # (trunk_list[i] input dims mismatch `basis`, and the einsum contraction dims
        # 128 vs num_layers*128 disagree); the runnable demo uses num_layers == 1.
        new_basis = run_mlp(prep["trunk"][i], basis)[:basis.shape[0]]
        basis = jnp.concatenate([basis, new_basis], axis=1)

    Hb = branch_out.shape[1] // C
    Ht = basis.shape[1] // C
    assert Hb == Ht, "einsum('bci,nci->bnc') requires matching per-channel widths"

    # Combine tiling, decoupled from the MLP row tiles: lane-dense output blocks
    # (tile_n multiple of 128), tile_b a multiple of 16.
    tile_b = min(256, _round_up(B, 16))
    tile_n = min(1024, _round_up(N, 128))
    Bp = _round_up(B, tile_b)
    Np = _round_up(N, tile_n)
    xb = _pad_rows(branch_out, Bp)
    gt = _pad_rows(basis, Np)

    # einsum('bci,nci->bnc') + b, channel-major & lane-dense in-kernel.
    comb = combine_pallas(xb, gt, prep["b"], C, Hb, tile_b, tile_n)

    # Slice off padded rows/points; one XLA transpose to the PyTorch output
    # layout [B, N, C] (C < 128 is not lane-dense, so the kernel output stays
    # channel-major and f32 per the module contract).
    return comb[:, :B, :N].transpose(1, 2, 0)


def densedon3d_reference(params, x, grid, *, query_dim, out_channel):
    """Pure-JAX reference using the same bf16-operand / f32-accumulate matmul
    policy as the kernels (PyTorch runs this module in pure f32; expect ~1e-2
    relative deviation from pure f32 due to the bf16 MXU inputs)."""
    B = x.shape[0]
    g = grid[0].reshape(-1, query_dim).astype(jnp.float32)
    N = g.shape[0]

    def mlp(h, Ws, bs):
        for i, (W, b) in enumerate(zip(Ws, bs)):
            z = jnp.dot(h.astype(MATMUL_DTYPE), W.astype(MATMUL_DTYPE),
                        preferred_element_type=jnp.float32) + b
            h = _gelu_exact(z) if i < len(Ws) - 1 else z
        return h

    xb = mlp(x.reshape(B, -1), *params["branch"])
    basis = mlp(g, *params["trunk"][0])
    for i in range(1, len(params["trunk"])):
        basis = jnp.concatenate([basis, mlp(basis, *params["trunk"][i])], axis=1)

    xb = xb.astype(MATMUL_DTYPE).reshape(B, out_channel, -1)
    basis = basis.astype(MATMUL_DTYPE).reshape(N, out_channel, -1)
    out = jnp.einsum("bci,nci->bnc", xb, basis, preferred_element_type=jnp.float32)
    return out + params["b"]


# ----------------------------------------------------------------------------
if __name__ == "__main__":
    size = 8
    query_dim = 3
    time_step = 2
    in_channel_branch = 1
    out_channel = 2
    num_layers = 1          # see TODO(synk): only num_layers == 1 is self-consistent
    B = 2
    GD = GH = GW = 4        # 4*4*4 = 64 query points

    key = jax.random.PRNGKey(0)
    k_x, k_g, k_p = jax.random.split(key, 3)
    x = jax.random.normal(k_x, (B, in_channel_branch, time_step, size, size), jnp.float32)
    grid = jax.random.normal(k_g, (B, GD, GH, GW, query_dim), jnp.float32)
    # bias_scale > 0 exercises all bias-add paths (PyTorch initializes them to zero).
    params = init_densedon3d_params(k_p, size, query_dim, time_step, in_channel_branch,
                                    out_channel, num_layers, bias_scale=0.1)
    prep = prepare_params(params)

    # Prime the hardware probes eagerly (outside jit).
    _vmem_limit()
    _buffered_weights_supported()

    fwd = jax.jit(partial(densedon3d_pallas, query_dim=query_dim))
    out = jax.block_until_ready(fwd(prep, x, grid))

    ref = densedon3d_reference(params, x, grid, query_dim=query_dim, out_channel=out_channel)
    assert out.shape == (B, GD * GH * GW, out_channel), out.shape
    np.testing.assert_allclose(np.asarray(out), np.asarray(ref), rtol=1e-2, atol=1e-2)
    print("KERNEL_OK")
</pallas_src>

<mosaic_0001>
module attributes {stable_mosaic.version = 11 : i64} {
  func.func @k(%arg0: i32, %arg1: memref<8x128xf32, #tpu.memory_space<vmem>>, %arg2: memref<8x128xf32, #tpu.memory_space<vmem>>, %arg3: memref<8x128xf32, #tpu.memory_space<vmem>>) attributes {dimension_semantics = [#tpu.dimension_semantics<arbitrary>], iteration_bounds = array<i64: 2>, scalar_prefetch = 0 : i64, scratch_operands = 0 : i64, tpu.core_type = #tpu.core_type<tc>, window_params = [{transform_indices = @transform_0, window_bounds = array<i64: 8, 128>}, {pipeline_mode = #tpu.pipeline_mode<synchronous>, transform_indices = @transform_1, window_bounds = array<i64: 8, 128>}, {transform_indices = @transform_2, window_bounds = array<i64: 8, 128>}]} {
    %c0 = arith.constant 0 : index
    %c0_0 = arith.constant 0 : index
    %0 = vector.load %arg1[%c0, %c0_0] : memref<8x128xf32, #tpu.memory_space<vmem>>, vector<8x128xf32>
    %c0_1 = arith.constant 0 : index
    %c0_2 = arith.constant 0 : index
    %1 = vector.load %arg2[%c0_1, %c0_2] : memref<8x128xf32, #tpu.memory_space<vmem>>, vector<8x128xf32>
    %2 = arith.addf %0, %1 : vector<8x128xf32>
    %c0_3 = arith.constant 0 : index
    %c0_4 = arith.constant 0 : index
    %3 = vector.load %arg3[%c0_3, %c0_4] : memref<8x128xf32, #tpu.memory_space<vmem>>, vector<8x128xf32>
    tpu.vector_store %arg3[%c0_3, %c0_4], %2 {strides = array<i32>} : memref<8x128xf32, #tpu.memory_space<vmem>>, vector<8x128xf32>,
    return
  }
  func.func @transform_0(%arg0: i32) -> (i32, i32) {
    %c0_i32 = arith.constant 0 : i32
    %c0_i32_0 = arith.constant 0 : i32
    return %arg0, %c0_i32 : i32, i32
  }
  func.func @transform_1(%arg0: i32) -> (i32, i32) {
    %c0_i32 = arith.constant 0 : i32
    %c0_i32_0 = arith.constant 0 : i32
    %c0_i32_1 = arith.constant 0 : i32
    return %c0_i32, %c0_i32_0 : i32, i32
  }
  func.func @transform_2(%arg0: i32) -> (i32, i32) {
    %c0_i32 = arith.constant 0 : i32
    %c0_i32_0 = arith.constant 0 : i32
    return %arg0, %c0_i32 : i32, i32
  }
}

module attributes {stable_mosaic.version = 11 : i64} {
  func.func @_mlp_kernel(%arg0: i32, %arg1: i32, %arg2: memref<32x128xbf16, #tpu.memory_space<vmem>>, %arg3: memref<128x128xbf16, #tpu.memory_space<vmem>>, %arg4: memref<1x128xf32, #tpu.memory_space<vmem>>, %arg5: memref<128x128xbf16, #tpu.memory_space<vmem>>, %arg6: memref<1x128xf32, #tpu.memory_space<vmem>>, %arg7: memref<128x128xbf16, #tpu.memory_space<vmem>>, %arg8: memref<1x128xf32, #tpu.memory_space<vmem>>, %arg9: memref<128x128xbf16, #tpu.memory_space<vmem>>, %arg10: memref<1x128xf32, #tpu.memory_space<vmem>>, %arg11: memref<128x256xbf16, #tpu.memory_space<vmem>>, %arg12: memref<1x256xf32, #tpu.memory_space<vmem>>, %arg13: memref<32x256xbf16, #tpu.memory_space<vmem>>, %arg14: memref<32x128xf32, #tpu.memory_space<vmem>>) attributes {dimension_semantics = [#tpu.dimension_semantics<parallel>, #tpu.dimension_semantics<arbitrary>], iteration_bounds = array<i64: 2, 1>, scalar_prefetch = 0 : i64, scratch_operands = 1 : i64, tpu.core_type = #tpu.core_type<tc>, window_params = [{transform_indices = @transform_0, window_bounds = array<i64: 32, 128>}, {pipeline_mode = #tpu.pipeline_mode<synchronous>, transform_indices = @transform_1, window_bounds = array<i64: 128, 128>}, {pipeline_mode = #tpu.pipeline_mode<synchronous>, transform_indices = @transform_2, window_bounds = array<i64: 1, 128>}, {pipeline_mode = #tpu.pipeline_mode<synchronous>, transform_indices = @transform_3, window_bounds = array<i64: 128, 128>}, {pipeline_mode = #tpu.pipeline_mode<synchronous>, transform_indices = @transform_4, window_bounds = array<i64: 1, 128>}, {pipeline_mode = #tpu.pipeline_mode<synchronous>, transform_indices = @transform_5, window_bounds = array<i64: 128, 128>}, {pipeline_mode = #tpu.pipeline_mode<synchronous>, transform_indices = @transform_6, window_bounds = array<i64: 1, 128>}, {pipeline_mode = #tpu.pipeline_mode<synchronous>, transform_indices = @transform_7, window_bounds = array<i64: 128, 128>}, {pipeline_mode = #tpu.pipeline_mode<synchronous>, transform_indices = @transform_8, window_bounds = array<i64: 1, 128>}, {pipeline_mode = #tpu.pipeline_mode<synchronous>, transform_indices = @transform_9, window_bounds = array<i64: 128, 256>}, {pipeline_mode = #tpu.pipeline_mode<synchronous>, transform_indices = @transform_10, window_bounds = array<i64: 1, 256>}, {transform_indices = @transform_11, window_bounds = array<i64: 32, 256>}]} {
    %c0_i32 = arith.constant 0 : i32
    %0 = arith.cmpi eq, %arg1, %c0_i32 : i32
    %1 = arith.extui %0 : i1 to i32
    %c0_i32_0 = arith.constant 0 : i32
    %2 = arith.cmpi ne, %1, %c0_i32_0 : i32
    scf.if %2 {
      %cst_10 = arith.constant 0.000000e+00 : f32
      %12 = vector.broadcast %cst_10 : f32 to vector<32x128xf32>
      %c0_11 = arith.constant 0 : index
      %c0_12 = arith.constant 0 : index
      %13 = vector.load %arg14[%c0_11, %c0_12] : memref<32x128xf32, #tpu.memory_space<vmem>>, vector<32x128xf32>
      tpu.vector_store %arg14[%c0_11, %c0_12], %12 {strides = array<i32>} : memref<32x128xf32, #tpu.memory_space<vmem>>, vector<32x128xf32>,
    } else {
    }
    %c0 = arith.constant 0 : index
    %c0_1 = arith.constant 0 : index
    %3 = vector.load %arg3[%c0, %c0_1] : memref<128x128xbf16, #tpu.memory_space<vmem>>, vector<128x128xbf16>
    %c0_2 = arith.constant 0 : index
    %c0_3 = arith.constant 0 : index
    %4 = vector.load %arg14[%c0_2, %c0_3] : memref<32x128xf32, #tpu.memory_space<vmem>>, vector<32x128xf32>
    %c0_4 = arith.constant 0 : index
    %c0_5 = arith.constant 0 : index
    %5 = vector.load %arg2[%c0_4, %c0_5] : memref<32x128xbf16, #tpu.memory_space<vmem>>, vector<32x128xbf16>
    %cst = arith.constant dense<0.000000e+00> : vector<32x128xf32>
    %6 = tpu.matmul %5, %3, %cst {dimension_numbers = #tpu.dot_dimension_numbers<[1], [0], [0], [1], [0, 0, 1, 1], [], []>} : vector<32x128xbf16>, vector<128x128xbf16>, vector<32x128xf32> -> vector<32x128xf32>
    %7 = arith.addf %4, %6 : vector<32x128xf32>
    %c0_6 = arith.constant 0 : index
    %c0_7 = arith.constant 0 : index
    %8 = vector.load %arg14[%c0_6, %c0_7] : memref<32x128xf32, #tpu.memory_space<vmem>>, vector<32x128xf32>
    tpu.vector_store %arg14[%c0_6, %c0_7], %7 {strides = array<i32>} : memref<32x128xf32, #tpu.memory_space<vmem>>, vector<32x128xf32>,
    %c0_i32_8 = arith.constant 0 : i32
    %9 = arith.cmpi eq, %arg1, %c0_i32_8 : i32
    %10 = arith.extui %9 : i1 to i32
    %c0_i32_9 = arith.constant 0 : i32
    %11 = arith.cmpi ne, %10, %c0_i32_9 : i32
    scf.if %11 {
      %c0_10 = arith.constant 0 : index
      %c0_11 = arith.constant 0 : index
      %12 = vector.load %arg14[%c0_10, %c0_11] : memref<32x128xf32, #tpu.memory_space<vmem>>, vector<32x128xf32>
      %c0_12 = arith.constant 0 : index
      %c0_13 = arith.constant 0 : index
      %13 = vector.load %arg4[%c0_12, %c0_13] : memref<1x128xf32, #tpu.memory_space<vmem>>, vector<1x128xf32>
      %14 = vector.broadcast %13 : vector<1x128xf32> to vector<32x128xf32>
      %15 = arith.addf %12, %14 : vector<32x128xf32>
      %cst_14 = arith.constant 5.000000e-01 : f32
      %16 = vector.broadcast %cst_14 : f32 to vector<32x128xf32>
      %17 = arith.mulf %16, %15 : vector<32x128xf32>
      %cst_15 = arith.constant 0.707106769 : f32
      %18 = vector.broadcast %cst_15 : f32 to vector<32x128xf32>
      %19 = arith.mulf %15, %18 : vector<32x128xf32>
      %20 = math.erf %19 : vector<32x128xf32>
      %cst_16 = arith.constant 1.000000e+00 : f32
      %21 = vector.broadcast %cst_16 : f32 to vector<32x128xf32>
      %22 = arith.addf %21, %20 : vector<32x128xf32>
      %23 = arith.mulf %17, %22 : vector<32x128xf32>
      %c0_17 = arith.constant 0 : index
      %c0_18 = arith.constant 0 : index
      %24 = vector.load %arg5[%c0_17, %c0_18] : memref<128x128xbf16, #tpu.memory_space<vmem>>, vector<128x128xbf16>
      %c0_19 = arith.constant 0 : index
      %c0_20 = arith.constant 0 : index
      %25 = vector.load %arg6[%c0_19, %c0_20] : memref<1x128xf32, #tpu.memory_space<vmem>>, vector<1x128xf32>
      %26 = arith.truncf %23 : vector<32x128xf32> to vector<32x128xbf16>
      %cst_21 = arith.constant dense<0.000000e+00> : vector<32x128xf32>
      %27 = tpu.matmul %26, %24, %cst_21 {dimension_numbers = #tpu.dot_dimension_numbers<[1], [0], [0], [1], [0, 0, 1, 1], [], []>} : vector<32x128xbf16>, vector<128x128xbf16>, vector<32x128xf32> -> vector<32x128xf32>
      %28 = vector.broadcast %25 : vector<1x128xf32> to vector<32x128xf32>
      %29 = arith.addf %27, %28 : vector<32x128xf32>
      %cst_22 = arith.constant 5.000000e-01 : f32
      %30 = vector.broadcast %cst_22 : f32 to vector<32x128xf32>
      %31 = arith.mulf %30, %29 : vector<32x128xf32>
      %cst_23 = arith.constant 0.707106769 : f32
      %32 = vector.broadcast %cst_23 : f32 to vector<32x128xf32>
      %33 = arith.mulf %29, %32 : vector<32x128xf32>
      %34 = math.erf %33 : vector<32x128xf32>
      %cst_24 = arith.constant 1.000000e+00 : f32
      %35 = vector.broadcast %cst_24 : f32 to vector<32x128xf32>
      %36 = arith.addf %35, %34 : vector<32x128xf32>
      %37 = arith.mulf %31, %36 : vector<32x128xf32>
      %c0_25 = arith.constant 0 : index
      %c0_26 = arith.constant 0 : index
      %38 = vector.load %arg7[%c0_25, %c0_26] : memref<128x128xbf16, #tpu.memory_space<vmem>>, vector<128x128xbf16>
      %c0_27 = arith.constant 0 : index
      %c0_28 = arith.constant 0 : index
      %39 = vector.load %arg8[%c0_27, %c0_28] : memref<1x128xf32, #tpu.memory_space<vmem>>, vector<1x128xf32>
      %40 = arith.truncf %37 : vector<32x128xf32> to vector<32x128xbf16>
      %cst_29 = arith.constant dense<0.000000e+00> : vector<32x128xf32>
      %41 = tpu.matmul %40, %38, %cst_29 {dimension_numbers = #tpu.dot_dimension_numbers<[1], [0], [0], [1], [0, 0, 1, 1], [], []>} : vector<32x128xbf16>, vector<128x128xbf16>, vector<32x128xf32> -> vector<32x128xf32>
      %42 = vector.broadcast %39 : vector<1x128xf32> to vector<32x128xf32>
      %43 = arith.addf %41, %42 : vector<32x128xf32>
      %cst_30 = arith.constant 5.000000e-01 : f32
      %44 = vector.broadcast %cst_30 : f32 to vector<32x128xf32>
      %45 = arith.mulf %44, %43 : vector<32x128xf32>
      %cst_31 = arith.constant 0.707106769 : f32
      %46 = vector.broadcast %cst_31 : f32 to vector<32x128xf32>
      %47 = arith.mulf %43, %46 : vector<32x128xf32>
      %48 = math.erf %47 : vector<32x128xf32>
      %cst_32 = arith.constant 1.000000e+00 : f32
      %49 = vector.broadcast %cst_32 : f32 to vector<32x128xf32>
      %50 = arith.addf %49, %48 : vector<32x128xf32>
      %51 = arith.mulf %45, %50 : vector<32x128xf32>
      %c0_33 = arith.constant 0 : index
      %c0_34 = arith.constant 0 : index
      %52 = vector.load %arg9[%c0_33, %c0_34] : memref<128x128xbf16, #tpu.memory_space<vmem>>, vector<128x128xbf16>
      %c0_35 = arith.constant 0 : index
      %c0_36 = arith.constant 0 : index
      %53 = vector.load %arg10[%c0_35, %c0_36] : memref<1x128xf32, #tpu.memory_space<vmem>>, vector<1x128xf32>
      %54 = arith.truncf %51 : vector<32x128xf32> to vector<32x128xbf16>
      %cst_37 = arith.constant dense<0.000000e+00> : vector<32x128xf32>
      %55 = tpu.matmul %54, %52, %cst_37 {dimension_numbers = #tpu.dot_dimension_numbers<[1], [0], [0], [1], [0, 0, 1, 1], [], []>} : vector<32x128xbf16>, vector<128x128xbf16>, vector<32x128xf32> -> vector<32x128xf32>
      %56 = vector.broadcast %53 : vector<1x128xf32> to vector<32x128xf32>
      %57 = arith.addf %55, %56 : vector<32x128xf32>
      %cst_38 = arith.constant 5.000000e-01 : f32
      %58 = vector.broadcast %cst_38 : f32 to vector<32x128xf32>
      %59 = arith.mulf %58, %57 : vector<32x128xf32>
      %cst_39 = arith.constant 0.707106769 : f32
      %60 = vector.broadcast %cst_39 : f32 to vector<32x128xf32>
      %61 = arith.mulf %57, %60 : vector<32x128xf32>
      %62 = math.erf %61 : vector<32x128xf32>
      %cst_40 = arith.constant 1.000000e+00 : f32
      %63 = vector.broadcast %cst_40 : f32 to vector<32x128xf32>
      %64 = arith.addf %63, %62 : vector<32x128xf32>
      %65 = arith.mulf %59, %64 : vector<32x128xf32>
      %c0_41 = arith.constant 0 : index
      %c0_42 = arith.constant 0 : index
      %66 = vector.load %arg11[%c0_41, %c0_42] : memref<128x256xbf16, #tpu.memory_space<vmem>>, vector<128x256xbf16>
      %c0_43 = arith.constant 0 : index
      %c0_44 = arith.constant 0 : index
      %67 = vector.load %arg12[%c0_43, %c0_44] : memref<1x256xf32, #tpu.memory_space<vmem>>, vector<1x256xf32>
      %68 = arith.truncf %65 : vector<32x128xf32> to vector<32x128xbf16>
      %cst_45 = arith.constant dense<0.000000e+00> : vector<32x256xf32>
      %69 = tpu.matmul %68, %66, %cst_45 {dimension_numbers = #tpu.dot_dimension_numbers<[1], [0], [0], [1], [0, 0, 1, 1], [], []>} : vector<32x128xbf16>, vector<128x256xbf16>, vector<32x256xf32> -> vector<32x256xf32>
      %70 = vector.broadcast %67 : vector<1x256xf32> to vector<32x256xf32>
      %71 = arith.addf %69, %70 : vector<32x256xf32>
      %72 = arith.truncf %71 : vector<32x256xf32> to vector<32x256xbf16>
      %c0_46 = arith.constant 0 : index
      %c0_47 = arith.constant 0 : index
      %73 = vector.load %arg13[%c0_46, %c0_47] : memref<32x256xbf16, #tpu.memory_space<vmem>>, vector<32x256xbf16>
      tpu.vector_store %arg13[%c0_46, %c0_47], %72 {strides = array<i32>} : memref<32x256xbf16, #tpu.memory_space<vmem>>, vector<32x256xbf16>,
    } else {
    }
    return
  }
  func.func @transform_0(%arg0: i32, %arg1: i32) -> (i32, i32) {
    %c0_i32 = arith.constant 0 : i32
    return %arg0, %arg1 : i32, i32
  }
  func.func @transform_1(%arg0: i32, %arg1: i32) -> (i32, i32) {
    %c0_i32 = arith.constant 0 : i32
    %c0_i32_0 = arith.constant 0 : i32
    %c0_i32_1 = arith.constant 0 : i32
    return %c0_i32, %c0_i32_0 : i32, i32
  }
  func.func @transform_2(%arg0: i32, %arg1: i32) -> (i32, i32) {
    %c0_i32 = arith.constant 0 : i32
    %c0_i32_0 = arith.constant 0 : i32
    %c0_i32_1 = arith.constant 0 : i32
    return %c0_i32, %c0_i32_0 : i32, i32
  }
  func.func @transform_3(%arg0: i32, %arg1: i32) -> (i32, i32) {
    %c0_i32 = arith.constant 0 : i32
    %c0_i32_0 = arith.constant 0 : i32
    %c0_i32_1 = arith.constant 0 : i32
    return %c0_i32, %c0_i32_0 : i32, i32
  }
  func.func @transform_4(%arg0: i32, %arg1: i32) -> (i32, i32) {
    %c0_i32 = arith.constant 0 : i32
    %c0_i32_0 = arith.constant 0 : i32
    %c0_i32_1 = arith.constant 0 : i32
    return %c0_i32, %c0_i32_0 : i32, i32
  }
  func.func @transform_5(%arg0: i32, %arg1: i32) -> (i32, i32) {
    %c0_i32 = arith.constant 0 : i32
    %c0_i32_0 = arith.constant 0 : i32
    %c0_i32_1 = arith.constant 0 : i32
    return %c0_i32, %c0_i32_0 : i32, i32
  }
  func.func @transform_6(%arg0: i32, %arg1: i32) -> (i32, i32) {
    %c0_i32 = arith.constant 0 : i32
    %c0_i32_0 = arith.constant 0 : i32
    %c0_i32_1 = arith.constant 0 : i32
    return %c0_i32, %c0_i32_0 : i32, i32
  }
  func.func @transform_7(%arg0: i32, %arg1: i32) -> (i32, i32) {
    %c0_i32 = arith.constant 0 : i32
    %c0_i32_0 = arith.constant 0 : i32
    %c0_i32_1 = arith.constant 0 : i32
    return %c0_i32, %c0_i32_0 : i32, i32
  }
  func.func @transform_8(%arg0: i32, %arg1: i32) -> (i32, i32) {
    %c0_i32 = arith.constant 0 : i32
    %c0_i32_0 = arith.constant 0 : i32
    %c0_i32_1 = arith.constant 0 : i32
    return %c0_i32, %c0_i32_0 : i32, i32
  }
  func.func @transform_9(%arg0: i32, %arg1: i32) -> (i32, i32) {
    %c0_i32 = arith.constant 0 : i32
    %c0_i32_0 = arith.constant 0 : i32
    %c0_i32_1 = arith.constant 0 : i32
    return %c0_i32, %c0_i32_0 : i32, i32
  }
  func.func @transform_10(%arg0: i32, %arg1: i32) -> (i32, i32) {
    %c0_i32 = arith.constant 0 : i32
    %c0_i32_0 = arith.constant 0 : i32
    %c0_i32_1 = arith.constant 0 : i32
    return %c0_i32, %c0_i32_0 : i32, i32
  }
  func.func @transform_11(%arg0: i32, %arg1: i32) -> (i32, i32) {
    %c0_i32 = arith.constant 0 : i32
    %c0_i32_0 = arith.constant 0 : i32
    return %arg0, %c0_i32 : i32, i32
  }
}

module attributes {stable_mosaic.version = 11 : i64} {
  func.func @_combine_kernel(%arg0: i32, %arg1: i32, %arg2: i32, %arg3: memref<16x128xbf16, #tpu.memory_space<vmem>>, %arg4: memref<128x128xbf16, #tpu.memory_space<vmem>>, %arg5: memref<2xf32, #tpu.memory_space<smem>>, %arg6: memref<1x16x128xf32, #tpu.memory_space<vmem>>) attributes {dimension_semantics = [#tpu.dimension_semantics<parallel>, #tpu.dimension_semantics<parallel>, #tpu.dimension_semantics<parallel>], iteration_bounds = array<i64: 2, 1, 1>, scalar_prefetch = 0 : i64, scratch_operands = 0 : i64, tpu.core_type = #tpu.core_type<tc>, window_params = [{transform_indices = @transform_0, window_bounds = array<i64: 16, 128>}, {transform_indices = @transform_1, window_bounds = array<i64: 128, 128>}, {transform_indices = @transform_2, window_bounds = array<i64: 2>}, {transform_indices = @transform_3, window_bounds = array<i64: 1, 16, 128>}]} {
    %c0 = arith.constant 0 : index
    %c0_0 = arith.constant 0 : index
    %0 = vector.load %arg3[%c0, %c0_0] : memref<16x128xbf16, #tpu.memory_space<vmem>>, vector<16x128xbf16>
    %c0_1 = arith.constant 0 : index
    %c0_2 = arith.constant 0 : index
    %1 = vector.load %arg4[%c0_1, %c0_2] : memref<128x128xbf16, #tpu.memory_space<vmem>>, vector<128x128xbf16>
    %cst = arith.constant dense<0.000000e+00> : vector<16x128xf32>
    %2 = tpu.matmul %0, %1, %cst {dimension_numbers = #tpu.dot_dimension_numbers<[1], [1], [0], [0], [0, 0, 1, 0], [], []>} : vector<16x128xbf16>, vector<128x128xbf16>, vector<16x128xf32> -> vector<16x128xf32>
    %3 = arith.index_cast %arg0 : i32 to index
    %4 = memref.load %arg5[%3] : memref<2xf32, #tpu.memory_space<smem>>
    %5 = vector.broadcast %4 : f32 to vector<16x128xf32>
    %6 = arith.addf %2, %5 : vector<16x128xf32>
    %c0_3 = arith.constant 0 : index
    %c0_4 = arith.constant 0 : index
    %c0_5 = arith.constant 0 : index
    %7 = vector.load %arg6[%c0_3, %c0_4, %c0_5] : memref<1x16x128xf32, #tpu.memory_space<vmem>>, vector<1x16x128xf32>
    %8 = vector.shape_cast %7 : vector<1x16x128xf32> to vector<16x128xf32>
    %9 = vector.shape_cast %6 : vector<16x128xf32> to vector<1x16x128xf32>
    tpu.vector_store %arg6[%c0_3, %c0_4, %c0_5], %9 {strides = array<i32>} : memref<1x16x128xf32, #tpu.memory_space<vmem>>, vector<1x16x128xf32>,
    return
  }
  func.func @transform_0(%arg0: i32, %arg1: i32, %arg2: i32) -> (i32, i32) {
    %c0_i32 = arith.constant 0 : i32
    return %arg2, %arg0 : i32, i32
  }
  func.func @transform_1(%arg0: i32, %arg1: i32, %arg2: i32) -> (i32, i32) {
    %c0_i32 = arith.constant 0 : i32
    return %arg1, %arg0 : i32, i32
  }
  func.func @transform_2(%arg0: i32, %arg1: i32, %arg2: i32) -> i32 {
    %c0_i32 = arith.constant 0 : i32
    %c0_i32_0 = arith.constant 0 : i32
    return %c0_i32 : i32
  }
  func.func @transform_3(%arg0: i32, %arg1: i32, %arg2: i32) -> (i32, i32, i32) {
    %c0_i32 = arith.constant 0 : i32
    return %arg0, %arg2, %arg1 : i32, i32, i32
  }
}

module attributes {stable_mosaic.version = 11 : i64} {
  func.func @_mlp_kernel(%arg0: i32, %arg1: i32, %arg2: memref<16x128xbf16, #tpu.memory_space<vmem>>, %arg3: memref<128x128xbf16, #tpu.memory_space<vmem>>, %arg4: memref<1x128xf32, #tpu.memory_space<vmem>>, %arg5: memref<128x128xbf16, #tpu.memory_space<vmem>>, %arg6: memref<1x128xf32, #tpu.memory_space<vmem>>, %arg7: memref<128x128xbf16, #tpu.memory_space<vmem>>, %arg8: memref<1x128xf32, #tpu.memory_space<vmem>>, %arg9: memref<128x128xbf16, #tpu.memory_space<vmem>>, %arg10: memref<1x128xf32, #tpu.memory_space<vmem>>, %arg11: memref<128x256xbf16, #tpu.memory_space<vmem>>, %arg12: memref<1x256xf32, #tpu.memory_space<vmem>>, %arg13: memref<16x256xbf16, #tpu.memory_space<vmem>>, %arg14: memref<16x128xf32, #tpu.memory_space<vmem>>) attributes {dimension_semantics = [#tpu.dimension_semantics<parallel>, #tpu.dimension_semantics<arbitrary>], iteration_bounds = array<i64: 1, 1>, scalar_prefetch = 0 : i64, scratch_operands = 1 : i64, tpu.core_type = #tpu.core_type<tc>, window_params = [{transform_indices = @transform_0, window_bounds = array<i64: 16, 128>}, {pipeline_mode = #tpu.pipeline_mode<synchronous>, transform_indices = @transform_1, window_bounds = array<i64: 128, 128>}, {pipeline_mode = #tpu.pipeline_mode<synchronous>, transform_indices = @transform_2, window_bounds = array<i64: 1, 128>}, {pipeline_mode = #tpu.pipeline_mode<synchronous>, transform_indices = @transform_3, window_bounds = array<i64: 128, 128>}, {pipeline_mode = #tpu.pipeline_mode<synchronous>, transform_indices = @transform_4, window_bounds = array<i64: 1, 128>}, {pipeline_mode = #tpu.pipeline_mode<synchronous>, transform_indices = @transform_5, window_bounds = array<i64: 128, 128>}, {pipeline_mode = #tpu.pipeline_mode<synchronous>, transform_indices = @transform_6, window_bounds = array<i64: 1, 128>}, {pipeline_mode = #tpu.pipeline_mode<synchronous>, transform_indices = @transform_7, window_bounds = array<i64: 128, 128>}, {pipeline_mode = #tpu.pipeline_mode<synchronous>, transform_indices = @transform_8, window_bounds = array<i64: 1, 128>}, {pipeline_mode = #tpu.pipeline_mode<synchronous>, transform_indices = @transform_9, window_bounds = array<i64: 128, 256>}, {pipeline_mode = #tpu.pipeline_mode<synchronous>, transform_indices = @transform_10, window_bounds = array<i64: 1, 256>}, {transform_indices = @transform_11, window_bounds = array<i64: 16, 256>}]} {
    %c0_i32 = arith.constant 0 : i32
    %0 = arith.cmpi eq, %arg1, %c0_i32 : i32
    %1 = arith.extui %0 : i1 to i32
    %c0_i32_0 = arith.constant 0 : i32
    %2 = arith.cmpi ne, %1, %c0_i32_0 : i32
    scf.if %2 {
      %cst_10 = arith.constant 0.000000e+00 : f32
      %12 = vector.broadcast %cst_10 : f32 to vector<16x128xf32>
      %c0_11 = arith.constant 0 : index
      %c0_12 = arith.constant 0 : index
      %13 = vector.load %arg14[%c0_11, %c0_12] : memref<16x128xf32, #tpu.memory_space<vmem>>, vector<16x128xf32>
      tpu.vector_store %arg14[%c0_11, %c0_12], %12 {strides = array<i32>} : memref<16x128xf32, #tpu.memory_space<vmem>>, vector<16x128xf32>,
    } else {
    }
    %c0 = arith.constant 0 : index
    %c0_1 = arith.constant 0 : index
    %3 = vector.load %arg3[%c0, %c0_1] : memref<128x128xbf16, #tpu.memory_space<vmem>>, vector<128x128xbf16>
    %c0_2 = arith.constant 0 : index
    %c0_3 = arith.constant 0 : index
    %4 = vector.load %arg14[%c0_2, %c0_3] : memref<16x128xf32, #tpu.memory_space<vmem>>, vector<16x128xf32>
    %c0_4 = arith.constant 0 : index
    %c0_5 = arith.constant 0 : index
    %5 = vector.load %arg2[%c0_4, %c0_5] : memref<16x128xbf16, #tpu.memory_space<vmem>>, vector<16x128xbf16>
    %cst = arith.constant dense<0.000000e+00> : vector<16x128xf32>
    %6 = tpu.matmul %5, %3, %cst {dimension_numbers = #tpu.dot_dimension_numbers<[1], [0], [0], [1], [0, 0, 1, 1], [], []>} : vector<16x128xbf16>, vector<128x128xbf16>, vector<16x128xf32> -> vector<16x128xf32>
    %7 = arith.addf %4, %6 : vector<16x128xf32>
    %c0_6 = arith.constant 0 : index
    %c0_7 = arith.constant 0 : index
    %8 = vector.load %arg14[%c0_6, %c0_7] : memref<16x128xf32, #tpu.memory_space<vmem>>, vector<16x128xf32>
    tpu.vector_store %arg14[%c0_6, %c0_7], %7 {strides = array<i32>} : memref<16x128xf32, #tpu.memory_space<vmem>>, vector<16x128xf32>,
    %c0_i32_8 = arith.constant 0 : i32
    %9 = arith.cmpi eq, %arg1, %c0_i32_8 : i32
    %10 = arith.extui %9 : i1 to i32
    %c0_i32_9 = arith.constant 0 : i32
    %11 = arith.cmpi ne, %10, %c0_i32_9 : i32
    scf.if %11 {
      %c0_10 = arith.constant 0 : index
      %c0_11 = arith.constant 0 : index
      %12 = vector.load %arg14[%c0_10, %c0_11] : memref<16x128xf32, #tpu.memory_space<vmem>>, vector<16x128xf32>
      %c0_12 = arith.constant 0 : index
      %c0_13 = arith.constant 0 : index
      %13 = vector.load %arg4[%c0_12, %c0_13] : memref<1x128xf32, #tpu.memory_space<vmem>>, vector<1x128xf32>
      %14 = vector.broadcast %13 : vector<1x128xf32> to vector<16x128xf32>
      %15 = arith.addf %12, %14 : vector<16x128xf32>
      %cst_14 = arith.constant 5.000000e-01 : f32
      %16 = vector.broadcast %cst_14 : f32 to vector<16x128xf32>
      %17 = arith.mulf %16, %15 : vector<16x128xf32>
      %cst_15 = arith.constant 0.707106769 : f32
      %18 = vector.broadcast %cst_15 : f32 to vector<16x128xf32>
      %19 = arith.mulf %15, %18 : vector<16x128xf32>
      %20 = math.erf %19 : vector<16x128xf32>
      %cst_16 = arith.constant 1.000000e+00 : f32
      %21 = vector.broadcast %cst_16 : f32 to vector<16x128xf32>
      %22 = arith.addf %21, %20 : vector<16x128xf32>
      %23 = arith.mulf %17, %22 : vector<16x128xf32>
      %c0_17 = arith.constant 0 : index
      %c0_18 = arith.constant 0 : index
      %24 = vector.load %arg5[%c0_17, %c0_18] : memref<128x128xbf16, #tpu.memory_space<vmem>>, vector<128x128xbf16>
      %c0_19 = arith.constant 0 : index
      %c0_20 = arith.constant 0 : index
      %25 = vector.load %arg6[%c0_19, %c0_20] : memref<1x128xf32, #tpu.memory_space<vmem>>, vector<1x128xf32>
      %26 = arith.truncf %23 : vector<16x128xf32> to vector<16x128xbf16>
      %cst_21 = arith.constant dense<0.000000e+00> : vector<16x128xf32>
      %27 = tpu.matmul %26, %24, %cst_21 {dimension_numbers = #tpu.dot_dimension_numbers<[1], [0], [0], [1], [0, 0, 1, 1], [], []>} : vector<16x128xbf16>, vector<128x128xbf16>, vector<16x128xf32> -> vector<16x128xf32>
      %28 = vector.broadcast %25 : vector<1x128xf32> to vector<16x128xf32>
      %29 = arith.addf %27, %28 : vector<16x128xf32>
      %cst_22 = arith.constant 5.000000e-01 : f32
      %30 = vector.broadcast %cst_22 : f32 to vector<16x128xf32>
      %31 = arith.mulf %30, %29 : vector<16x128xf32>
      %cst_23 = arith.constant 0.707106769 : f32
      %32 = vector.broadcast %cst_23 : f32 to vector<16x128xf32>
      %33 = arith.mulf %29, %32 : vector<16x128xf32>
      %34 = math.erf %33 : vector<16x128xf32>
      %cst_24 = arith.constant 1.000000e+00 : f32
      %35 = vector.broadcast %cst_24 : f32 to vector<16x128xf32>
      %36 = arith.addf %35, %34 : vector<16x128xf32>
      %37 = arith.mulf %31, %36 : vector<16x128xf32>
      %c0_25 = arith.constant 0 : index
      %c0_26 = arith.constant 0 : index
      %38 = vector.load %arg7[%c0_25, %c0_26] : memref<128x128xbf16, #tpu.memory_space<vmem>>, vector<128x128xbf16>
      %c0_27 = arith.constant 0 : index
      %c0_28 = arith.constant 0 : index
      %39 = vector.load %arg8[%c0_27, %c0_28] : memref<1x128xf32, #tpu.memory_space<vmem>>, vector<1x128xf32>
      %40 = arith.truncf %37 : vector<16x128xf32> to vector<16x128xbf16>
      %cst_29 = arith.constant dense<0.000000e+00> : vector<16x128xf32>
      %41 = tpu.matmul %40, %38, %cst_29 {dimension_numbers = #tpu.dot_dimension_numbers<[1], [0], [0], [1], [0, 0, 1, 1], [], []>} : vector<16x128xbf16>, vector<128x128xbf16>, vector<16x128xf32> -> vector<16x128xf32>
      %42 = vector.broadcast %39 : vector<1x128xf32> to vector<16x128xf32>
      %43 = arith.addf %41, %42 : vector<16x128xf32>
      %cst_30 = arith.constant 5.000000e-01 : f32
      %44 = vector.broadcast %cst_30 : f32 to vector<16x128xf32>
      %45 = arith.mulf %44, %43 : vector<16x128xf32>
      %cst_31 = arith.constant 0.707106769 : f32
      %46 = vector.broadcast %cst_31 : f32 to vector<16x128xf32>
      %47 = arith.mulf %43, %46 : vector<16x128xf32>
      %48 = math.erf %47 : vector<16x128xf32>
      %cst_32 = arith.constant 1.000000e+00 : f32
      %49 = vector.broadcast %cst_32 : f32 to vector<16x128xf32>
      %50 = arith.addf %49, %48 : vector<16x128xf32>
      %51 = arith.mulf %45, %50 : vector<16x128xf32>
      %c0_33 = arith.constant 0 : index
      %c0_34 = arith.constant 0 : index
      %52 = vector.load %arg9[%c0_33, %c0_34] : memref<128x128xbf16, #tpu.memory_space<vmem>>, vector<128x128xbf16>
      %c0_35 = arith.constant 0 : index
      %c0_36 = arith.constant 0 : index
      %53 = vector.load %arg10[%c0_35, %c0_36] : memref<1x128xf32, #tpu.memory_space<vmem>>, vector<1x128xf32>
      %54 = arith.truncf %51 : vector<16x128xf32> to vector<16x128xbf16>
      %cst_37 = arith.constant dense<0.000000e+00> : vector<16x128xf32>
      %55 = tpu.matmul %54, %52, %cst_37 {dimension_numbers = #tpu.dot_dimension_numbers<[1], [0], [0], [1], [0, 0, 1, 1], [], []>} : vector<16x128xbf16>, vector<128x128xbf16>, vector<16x128xf32> -> vector<16x128xf32>
      %56 = vector.broadcast %53 : vector<1x128xf32> to vector<16x128xf32>
      %57 = arith.addf %55, %56 : vector<16x128xf32>
      %cst_38 = arith.constant 5.000000e-01 : f32
      %58 = vector.broadcast %cst_38 : f32 to vector<16x128xf32>
      %59 = arith.mulf %58, %57 : vector<16x128xf32>
      %cst_39 = arith.constant 0.707106769 : f32
      %60 = vector.broadcast %cst_39 : f32 to vector<16x128xf32>
      %61 = arith.mulf %57, %60 : vector<16x128xf32>
      %62 = math.erf %61 : vector<16x128xf32>
      %cst_40 = arith.constant 1.000000e+00 : f32
      %63 = vector.broadcast %cst_40 : f32 to vector<16x128xf32>
      %64 = arith.addf %63, %62 : vector<16x128xf32>
      %65 = arith.mulf %59, %64 : vector<16x128xf32>
      %c0_41 = arith.constant 0 : index
      %c0_42 = arith.constant 0 : index
      %66 = vector.load %arg11[%c0_41, %c0_42] : memref<128x256xbf16, #tpu.memory_space<vmem>>, vector<128x256xbf16>
      %c0_43 = arith.constant 0 : index
      %c0_44 = arith.constant 0 : index
      %67 = vector.load %arg12[%c0_43, %c0_44] : memref<1x256xf32, #tpu.memory_space<vmem>>, vector<1x256xf32>
      %68 = arith.truncf %65 : vector<16x128xf32> to vector<16x128xbf16>
      %cst_45 = arith.constant dense<0.000000e+00> : vector<16x256xf32>
      %69 = tpu.matmul %68, %66, %cst_45 {dimension_numbers = #tpu.dot_dimension_numbers<[1], [0], [0], [1], [0, 0, 1, 1], [], []>} : vector<16x128xbf16>, vector<128x256xbf16>, vector<16x256xf32> -> vector<16x256xf32>
      %70 = vector.broadcast %67 : vector<1x256xf32> to vector<16x256xf32>
      %71 = arith.addf %69, %70 : vector<16x256xf32>
      %72 = arith.truncf %71 : vector<16x256xf32> to vector<16x256xbf16>
      %c0_46 = arith.constant 0 : index
      %c0_47 = arith.constant 0 : index
      %73 = vector.load %arg13[%c0_46, %c0_47] : memref<16x256xbf16, #tpu.memory_space<vmem>>, vector<16x256xbf16>
      tpu.vector_store %arg13[%c0_46, %c0_47], %72 {strides = array<i32>} : memref<16x256xbf16, #tpu.memory_space<vmem>>, vector<16x256xbf16>,
    } else {
    }
    return
  }
  func.func @transform_0(%arg0: i32, %arg1: i32) -> (i32, i32) {
    %c0_i32 = arith.constant 0 : i32
    return %arg0, %arg1 : i32, i32
  }
  func.func @transform_1(%arg0: i32, %arg1: i32) -> (i32, i32) {
    %c0_i32 = arith.constant 0 : i32
    %c0_i32_0 = arith.constant 0 : i32
    %c0_i32_1 = arith.constant 0 : i32
    return %c0_i32, %c0_i32_0 : i32, i32
  }
  func.func @transform_2(%arg0: i32, %arg1: i32) -> (i32, i32) {
    %c0_i32 = arith.constant 0 : i32
    %c0_i32_0 = arith.constant 0 : i32
    %c0_i32_1 = arith.constant 0 : i32
    return %c0_i32, %c0_i32_0 : i32, i32
  }
  func.func @transform_3(%arg0: i32, %arg1: i32) -> (i32, i32) {
    %c0_i32 = arith.constant 0 : i32
    %c0_i32_0 = arith.constant 0 : i32
    %c0_i32_1 = arith.constant 0 : i32
    return %c0_i32, %c0_i32_0 : i32, i32
  }
  func.func @transform_4(%arg0: i32, %arg1: i32) -> (i32, i32) {
    %c0_i32 = arith.constant 0 : i32
    %c0_i32_0 = arith.constant 0 : i32
    %c0_i32_1 = arith.constant 0 : i32
    return %c0_i32, %c0_i32_0 : i32, i32
  }
  func.func @transform_5(%arg0: i32, %arg1: i32) -> (i32, i32) {
    %c0_i32 = arith.constant 0 : i32
    %c0_i32_0 = arith.constant 0 : i32
    %c0_i32_1 = arith.constant 0 : i32
    return %c0_i32, %c0_i32_0 : i32, i32
  }
  func.func @transform_6(%arg0: i32, %arg1: i32) -> (i32, i32) {
    %c0_i32 = arith.constant 0 : i32
    %c0_i32_0 = arith.constant 0 : i32
    %c0_i32_1 = arith.constant 0 : i32
    return %c0_i32, %c0_i32_0 : i32, i32
  }
  func.func @transform_7(%arg0: i32, %arg1: i32) -> (i32, i32) {
    %c0_i32 = arith.constant 0 : i32
    %c0_i32_0 = arith.constant 0 : i32
    %c0_i32_1 = arith.constant 0 : i32
    return %c0_i32, %c0_i32_0 : i32, i32
  }
  func.func @transform_8(%arg0: i32, %arg1: i32) -> (i32, i32) {
    %c0_i32 = arith.constant 0 : i32
    %c0_i32_0 = arith.constant 0 : i32
    %c0_i32_1 = arith.constant 0 : i32
    return %c0_i32, %c0_i32_0 : i32, i32
  }
  func.func @transform_9(%arg0: i32, %arg1: i32) -> (i32, i32) {
    %c0_i32 = arith.constant 0 : i32
    %c0_i32_0 = arith.constant 0 : i32
    %c0_i32_1 = arith.constant 0 : i32
    return %c0_i32, %c0_i32_0 : i32, i32
  }
  func.func @transform_10(%arg0: i32, %arg1: i32) -> (i32, i32) {
    %c0_i32 = arith.constant 0 : i32
    %c0_i32_0 = arith.constant 0 : i32
    %c0_i32_1 = arith.constant 0 : i32
    return %c0_i32, %c0_i32_0 : i32, i32
  }
  func.func @transform_11(%arg0: i32, %arg1: i32) -> (i32, i32) {
    %c0_i32 = arith.constant 0 : i32
    %c0_i32_0 = arith.constant 0 : i32
    return %arg0, %c0_i32 : i32, i32
  }
}

</mosaic_0001>

<bundles_post_ra>
// kernel: tpu_custom_call.1
= control target key start
LH: loop header
LB: loop body
LE: loop exit
PB: predicated region body
PF: predicated region fallthrough
CT: control target
= control target key end

     0   :  { %7 = vsyncpa [#allocation3], 0  ;;  %s649_s0 = inlined_call_operand.hbm [shape: f32[16,128], index: 0, kind: input, shape index: {}]   ;;  %s650_s1 = inlined_call_operand.hbm [shape: f32[8,128], index: 1, kind: input, shape index: {}]   ;;  %s651_s2 = inlined_call_operand.hbm [shape: f32[16,128], index: 2, kind: output, shape index: {}]  }
   0x1   :  { %9 = vsyncpa [#allocation3 + $0x1], 0 }
   0x2   :  { %10 = vsyncpa [#allocation6], 0 }
   0x3   :  { %11 = vsyncpa [#allocation4], 0 }
   0x4   :  { %13 = vsyncpa [#allocation4 + $0x1], 0  ;;  %s483_s9 = smov 0   ;;  %s485_s10 = smov 0  }
   0x5   :  { %s487_s11 = smov 0   ;;  %s489_s12 = smov 0  }
   0x6 LB: > { %s504_s13 = sadd.s32 4294967295, %s463_s12   ;;  %s270_s14 = sadd.s32 4294967294, %s463_s12   ;;  %s463_s12 = sphi %s489_s12, %s674_s12   ;;  %s459_s11 = sphi %s487_s11, %s673_s11   ;;  %s455_s10 = sphi %s485_s10, %s672_s10   ;;  %s451_s9 = sphi %s483_s9, %s671_s9  }
   0x7   : > { %p39_p0 = scmp.ne.s32.totalorder %s455_s10, %s451_s9  ;;  %p652_p1 = scmp.eq.s32.totalorder %s504_s13, 0 }
   0x8   : > { %p90_p3 = scmp.eq.s32.totalorder %s270_s14, 1  ;;  %p271_p5 = scmp.ge.s32.totalorder %s463_s12, 1 }
   0x9   : > { %p513_p4 = por %p652_p1, %p39_p0  ;;  %p97_p7 = scmp.lt.s32.totalorder %s463_s12, 3 }
   0xa   : > { %p518_p6 = por %p90_p3, %p39_p0  ;;  %s465_s18 = smov [#allocation5]  }
   0xb   : > { %s656_s15 = scalar_select %p513_p4, 1, 0 }
   0xc   : > { %s657_s16 = scalar_select %p518_p6, 1, 0 }
   0xd   : > { %p523_p8 = pnand %p271_p5, %p97_p7  ;;  %s110_s19 = sshll.u32 %s465_s18, 4  ;;  %s111_s19 = int_to_ptr.vmem [resolvable:$true] %s110_s19 }
   0xe   : > { %s531_s20 = sadd.s32 1, %s463_s12   ;;  %s26_s24 = sadd.s32 1, %s459_s11 }
   0xf   : > { %s658_s17 = scalar_select %p523_p8, 1, 0 }
  0x10   : > { %p292_p10 = pneg %p523_p8  ;;  %s23_s22 = ssub.s32 %s463_s12, %s531_s20 }
  0x11   : > { %p541_p12 = scmp.eq.s32.totalorder %s23_s22, 0  ;;  %p33_p13 = scmp.ne.s32.totalorder %s459_s11, %s455_s10 }
  0x12   : > { %p535_p11 = pnand %p292_p10, %p652_p1  ;;  %s352_s25 = scalar_lea.vmem %s111_s19, 128 }
  0x13   : > { %p353_p3 = scmp.ne.s32.totalorder %s111_s19, %s352_s25  ;;  %p360_p9 = scmp.lt.s32.totalorder %s111_s19, %s111_s19 }
  0x14   : > { %p343_p0 = pneg %p535_p11  ;;  %p361_p2 = scmp.lt.s32.totalorder %s352_s25, %s352_s25 }
  0x16   : > { %p355_p5 = pnand %p353_p3, %p343_p0  ;;  %p362_p10 = por %p361_p2, %p360_p9 }
  0x18   : > { %p356_p7 = pneg %p355_p5 }
  0x1a   : > { %p363_p1 = pnand %p362_p10, %p356_p7 }
  0x1c   : > { %366 = shalt.err (!%p363_p1)
}
  0x1d   : > { %295 = dma.hbm_to_vmem [thread:$0]  (!%p535_p11), %s650_s1, 128, %s111_s19, [#allocation6]  }
  0x1e   : > { %s558_s28 = scalar_select %p541_p12, %s459_s11, %s26_s24  }
  0x1f   : > { %p34_p1 = scmp.eq.s32.totalorder %s463_s12, 0  ;;  %p661_p2 = scmp.eq.s32.totalorder %s504_s13, 1 }
  0x20   : > { %p305_p0 = scmp.lt.s32.totalorder %s463_s12, 2  ;;  %s121_s30 = sand.u32 1, %s459_s11  }
  0x21   : > { %p566_p9 = por %p661_p2, %p33_p13  ;;  %p35_p3 = por %p34_p1, %p33_p13 }
  0x22   : > { %s274_s3 = sshll.u32 %s121_s30, 3  ;;  %s275_s4 = sshll.u32 %s463_s12, 7 }
  0x23   : > { %s662_s29 = scalar_select %p566_p9, 1, 0 }
  0x24   : > { %s579_s7 = scalar_lea.hbm %s649_s0, %s275_s4  ;;  %s125_s8 = scalar_lea.vmem [#allocation2], %s274_s3 }
  0x25   : > { %s132_s14 = sshll.u32 %s125_s8, 4  ;;  %p581_p11 = pnand %p305_p0, %p35_p3  ;;  %s133_s14 = int_to_ptr.vmem [resolvable:$true] %s132_s14 }
  0x26   : > { %s122_s19 = scalar_lea.sflag [#allocation3], %s121_s30  ;;  %s367_s21 = scalar_lea.hbm %s579_s7, 128 }
  0x27   : > { %p368_p12 = scmp.ne.s32.totalorder %s579_s7, %s367_s21  ;;  %p369_p13 = pneg %p581_p11 }
  0x28   : > { %s372_s24 = scalar_lea.hbm %s649_s0, 256  ;;  %p373_p10 = scmp.lt.s32.totalorder %s579_s7, %s649_s0 }
  0x29   : > { %p370_p5 = pnand %p369_p13, %p368_p12  ;;  %p374_p1 = scmp.lt.s32.totalorder %s372_s24, %s367_s21 }
  0x2b   : > { %p371_p7 = pneg %p370_p5  ;;  %p375_p2 = por %p374_p1, %p373_p10 }
  0x2d   : > { %p376_p0 = pnand %p375_p2, %p371_p7 }
  0x2f   : > { %379 = shalt.err (!%p376_p0)
}
  0x30   : > { %s380_s27 = scalar_lea.vmem %s133_s14, 128  ;;  %s466_s30 = smov [#allocation2]  }
  0x31   : > { %p381_p3 = scmp.ne.s32.totalorder %s133_s14, %s380_s27  ;;  %s385_s3 = sshll.u32 %s466_s30, 4  ;;  %s386_s3 = int_to_ptr.vmem [resolvable:$false] %s385_s3 }
  0x32   : > { %s387_s4 = scalar_lea.vmem %s386_s3, 256  ;;  %p388_p12 = scmp.lt.s32.totalorder %s133_s14, %s386_s3 }
  0x33   : > { %p383_p6 = pnand %p381_p3, %p369_p13  ;;  %p389_p5 = scmp.lt.s32.totalorder %s387_s4, %s380_s27 }
  0x35   : > { %p384_p9 = pneg %p383_p6  ;;  %p390_p4 = por %p389_p5, %p388_p12 }
  0x37   : > { %p391_p8 = pnand %p390_p4, %p384_p9 }
  0x39   : > { %394 = shalt.err (!%p391_p8)
}
  0x3a   : > { %299 = dma.hbm_to_vmem [thread:$0]  (!%p581_p11), %s579_s7, 128, %s133_s14, %s122_s19  }
  0x3b   : > { %p664_p7 = scmp.ne.s32.totalorder %s658_s17, 0 }
  0x3c   : > { %s602_s5 = sand.u32 (!%p664_p7), 1, %s455_s10   ;;  %p665_p6 = scmp.ne.s32.totalorder (!%p664_p7), %s656_s15, 0 }
  0x3d   : > { %141 = sbr.rel (%p664_p7) target bundleno = 95 (0x5f), region = 28  ;;  %s277_s6 = sshll.u32 (!%p664_p7), %s602_s5, 3 }
  0x3e   : > { %s144_s8 = scalar_lea.sflag (!%p664_p7), [#allocation3], %s602_s5  ;;  %s147_s21 = scalar_lea.vmem (!%p664_p7), [#allocation2], %s277_s6 }
  0x42   : > { %438 = dma.done.wait (%p665_p6), %s144_s8, 128  }
  0x43   : > { %440 = vsyncadd (%p665_p6), %s144_s8, 4294967168  ;;  %p666_p4 = scmp.eq.s32.totalorder %s504_s13, 0 }
  0x45   : > { %442 = dma.done.wait (%p666_p4), [#allocation6], 128   ;;  %p667_p8 = pmov %p666_p4 }
  0x46   : > { %s171_s17 = scalar_lea.vmem [#allocation7], %s277_s6  ;;  %s281_s14 = sshll.u32 %s504_s13, 7  ;;  %v172_v0 = vld [vmem:[%s147_s21] sm:$0xff]  ;;  %v173_v1 = vld [vmem:[#allocation5] sm:$0xff] }
  0x47   : > { %444 = vsyncadd (%p667_p8), [#allocation6], 4294967168  ;;  %s190_s7 = sshll.u32 %s171_s17, 4  ;;  %v174_v2 = vadd.f32 %v173_v1, %v172_v0  ;;  %s188_s15 = scalar_lea.hbm %s651_s2, %s281_s14  ;;  %s191_s7 = int_to_ptr.vmem [resolvable:$true] %s190_s7 }
  0x48   : > { %s177_s22 = scalar_lea.sflag [#allocation4], %s602_s5  ;;  %s395_s23 = scalar_lea.vmem %s191_s7, 128 }
  0x49   : > { %175 = vst [vmem:[%s171_s17] sm:$0xff] %v174_v2  ;;  %p396_p9 = scmp.ne.s32.totalorder %s191_s7, %s395_s23  ;;  %p668_p11 = scmp.ne.s32.totalorder %s662_s29, 0 }
  0x4a   : > { %s467_s24 = smov [#allocation7]  }
  0x4b   : > { %p397_p13 = pnand %p396_p9, %p668_p11  ;;  %s399_s25 = sshll.u32 %s467_s24, 4  ;;  %s400_s25 = int_to_ptr.vmem [resolvable:$false] %s399_s25 }
  0x4c   : > { %s401_s26 = scalar_lea.vmem %s400_s25, 256  ;;  %p402_p1 = scmp.lt.s32.totalorder %s191_s7, %s400_s25 }
  0x4d   : > { %p398_p10 = pneg %p397_p13  ;;  %p403_p2 = scmp.lt.s32.totalorder %s401_s26, %s395_s23 }
  0x4f   : > { %p404_p0 = por %p403_p2, %p402_p1 }
  0x51   : > { %p405_p3 = pnand %p404_p0, %p398_p10 }
  0x53   : > { %408 = shalt.err (!%p405_p3)
}
  0x54   : > { %s409_s13 = scalar_lea.hbm %s188_s15, 128  ;;  %s413_s3 = scalar_lea.hbm %s651_s2, 256 }
  0x55   : > { %p410_p12 = scmp.ne.s32.totalorder %s188_s15, %s409_s13  ;;  %p414_p6 = scmp.lt.s32.totalorder %s188_s15, %s651_s2 }
  0x56   : > { %p415_p4 = scmp.lt.s32.totalorder %s413_s3, %s409_s13 }
  0x57   : > { %p411_p5 = pnand %p410_p12, %p668_p11 }
  0x58   : > { %p416_p8 = por %p415_p4, %p414_p6 }
  0x59   : > { %p412_p7 = pneg %p411_p5 }
  0x5b   : > { %p417_p9 = pnand %p416_p8, %p412_p7 }
  0x5d   : > { %420 = shalt.err (!%p417_p9)
}
  0x5e   : > { %290 = dma.vmem_to_hbm [thread:$0]  (%p668_p11), %s191_s7, 128, %s188_s15, %s177_s22  }
  0x5f PF: > { %s202_s6 = sand.u32 1, %s451_s9   ;;  %p669_p13 = scmp.ne.s32.totalorder %s657_s16, 0 }
  0x60   : > { %p670_p10 = scmp.ge.s32.totalorder %s463_s12, 2  ;;  %s203_s8 = scalar_lea.sflag [#allocation4], %s202_s6 }
  0x62   : > { %p301_p1 = pnand %p670_p10, %p669_p13 }
  0x64   : > { %p302_p2 = pneg %p301_p1 }
  0x66   : > { %446 = dma.done.wait (%p302_p2), %s203_s8, 128  }
  0x67   : > { %448 = vsyncadd (%p302_p2), %s203_s8, 4294967168  ;;  %p16_p0 = scmp.ge.s32.totalorder %s531_s20, 4   ;;  %s671_s9 = smov %s455_s10 }
  0x68   : > { %s672_s10 = smov %s459_s11  ;;  %s673_s11 = smov %s558_s28 }
  0x69   : > { %s674_s12 = smov %s531_s20  ;;  %18 = sbr.rel (!%p16_p0) target bundleno = 6 (0x6), region = 77 }
  0x6e   :  { %208 = vsyncpa [#allocation3], 1 }
  0x6f   :  { %210 = vsyncpa [#allocation3 + $0x1], 1 }
  0x70   :  { %211 = vsyncpa [#allocation6], 1 }
  0x71   :  { %212 = vsyncpa [#allocation4], 1 }
  0x72   :  { %214 = vsyncpa [#allocation4 + $0x1], 1 }

// kernel: densedon3d_pallas.5
= control target key start
LH: loop header
LB: loop body
LE: loop exit
PB: predicated region body
PF: predicated region fallthrough
CT: control target
= control target key end

     0   :  { %8 = vsyncpa [#allocation5], 0  ;;  %s857_s12 = smov 0   ;;  %s859_s13 = smov 0   ;;  %s982_s0 = inlined_call_operand.vmem [shape: bf16[16,256], index: 0, kind: input, shape index: {}]   ;;  %s983_s1 = inlined_call_operand.vmem [shape: bf16[128,256], index: 1, kind: input, shape index: {}]   ;;  %s984_s2 = inlined_call_operand.vmem [shape: f32[2], index: 2, kind: input, shape index: {}]   ;;  %s985_s3 = inlined_call_operand.vmem [shape: f32[2,16,128], index: 3, kind: output, shape index: {}]  }
   0x1   :  { %s861_s14 = smov 0   ;;  %s863_s15 = smov 0  }
   0x2   :  { %s865_s16 = smov 0  }
   0x3 LB: > { %s657_s17 = sadd.s32 4294967295, %s832_s16   ;;  %s33_s18 = sadd.s32 1, %s828_s15  ;;  %s832_s16 = sphi %s865_s16, %s14_s16   ;;  %s828_s15 = sphi %s863_s15, %s992_s15   ;;  %s824_s14 = sphi %s861_s14, %s991_s14   ;;  %s820_s13 = sphi %s859_s13, %s990_s13   ;;  %s816_s12 = sphi %s857_s12, %s989_s12  }
   0x4   : > { %p35_p0 = scmp.ge.s32.totalorder %s33_s18, 2  ;;  %s42_s19 = sadd.s32 1, %s820_s13 }
   0x5   : > { %p49_p1 = scmp.ne.s32.totalorder %s820_s13, %s816_s12  ;;  %p50_p2 = scmp.eq.s32.totalorder %s832_s16, 0 }
   0x6   : > { %s994_s18 = smov (%p35_p0, %s33_s18), 0  ;;  %p659_p4 = scmp.ge.s32.totalorder %s832_s16, 1 }
   0x7   : > { %p890_p3 = por %p50_p2, %p49_p1  ;;  %s38_s21 = ssub.s32 %s828_s15, %s994_s18 }
   0x8   : > { %p145_p5 = scmp.lt.s32.totalorder %s832_s16, 3  ;;  %p40_p6 = scmp.eq.s32.totalorder %s38_s21, 0 }
   0x9   : > { %p902_p8 = scmp.eq.s32.totalorder %s657_s17, 0  ;;  %s158_s27 = sshll.u32 %s984_s2, 4  ;;  %s159_s27 = int_to_ptr.vmem [resolvable:$true] %s158_s27 }
   0xa   : > { %p898_p7 = pnand %p659_p4, %p145_p5  ;;  %s775_s28 = scalar_lea.vmem %s159_s27, 16 }
   0xb   : > { %s907_s24 = scalar_select %p40_p6, %s820_s13, %s42_s19  }
   0xc   : > { %p717_p9 = pneg %p898_p7  ;;  %p776_p11 = scmp.ne.s32.totalorder %s159_s27, %s775_s28 }
   0xd   : > { %p783_p1 = scmp.lt.s32.totalorder %s159_s27, %s159_s27  ;;  %p784_p2 = scmp.lt.s32.totalorder %s775_s28, %s775_s28 }
   0xe   : > { %p718_p10 = pnand %p902_p8, %p717_p9 }
   0xf   : > { %p785_p4 = por %p784_p2, %p783_p1 }
  0x10   : > { %p777_p12 = pneg %p718_p10 }
  0x12   : > { %p778_p13 = pnand %p777_p12, %p776_p11 }
  0x14   : > { %p779_p0 = pneg %p778_p13 }
  0x16   : > { %p786_p5 = pnand %p785_p4, %p779_p0 }
  0x18   : > { %789 = shalt.err (!%p786_p5)
}
  0x19   : > { %s834_s29 = smov [#allocation4]   ;;  %p661_p6 = scmp.ge.s32.totalorder %s832_s16, 2 }
  0x1a   : > { %720 = dma.vmem_to_smem (!%p718_p10), %s159_s27, 16, %s834_s29, [#allocation5]  }
  0x1b   : > { %165 = sbr.rel (%p661_p6) target bundleno = 51 (0x33), region = 20 }
  0x20   : > { %168 = sbr.rel (!%p890_p3) target bundleno = 37 (0x25), region = 24  ;;  %s170_s30 = sand.u32 (%p890_p3), 1, %s820_s13  }
  0x21   : > { %s663_s4 = sshll.u32 (%p890_p3), %s828_s15, 2  ;;  %s662_s5 = sshll.u32 (%p890_p3), %s170_s30, 3 }
  0x22   : > { %s177_s8 = scalar_lea.vmem (%p890_p3), %s982_s0, %s663_s4  ;;  %s172_s9 = scalar_lea.vmem (%p890_p3), [#allocation2], %s662_s5 }
  0x23   : > { %v194_v0 = vld [vmem:[%s177_s8] sm:$0xf] (%p890_p3)  ;;  %v196_v1 = vld [vmem:[%s177_s8 + $0x8] sm:$0xf] (%p890_p3) }
  0x24   : > { %195 = vst [vmem:[%s172_s9] sm:$0xf] (%p890_p3), %v194_v0  ;;  %197 = vst [vmem:[%s172_s9 + $0x4] sm:$0xf] (%p890_p3), %v196_v1 }
  0x25 PF: > { %225 = sbr.rel (!%p890_p3) target bundleno = 51 (0x33), region = 65  ;;  %s227_s10 = sand.u32 (%p890_p3), 1, %s820_s13  }
  0x26   : > { %s665_s11 = sshll.u32 (%p890_p3), %s828_s15, 2  ;;  %s664_s17 = sshll.u32 (%p890_p3), %s227_s10, 6 }
  0x27   : > { %s931_s25 = scalar_lea.vmem (%p890_p3), %s983_s1, %s665_s11  ;;  %s229_s20 = scalar_lea.vmem (%p890_p3), [#allocation3], %s664_s17 }
  0x28   : > { %v251_v2 = vld [vmem:[%s931_s25] sm:$0xf] (%p890_p3)  ;;  %v253_v3 = vld [vmem:[%s931_s25 + $0x8] sm:$0xf] (%p890_p3)  ;;  %v255_v4 = vld [vmem:[%s931_s25 + $0x10] sm:$0xf] (%p890_p3) }
  0x29   : > { %252 = vst [vmem:[%s229_s20] sm:$0xf] (%p890_p3), %v251_v2  ;;  %254 = vst [vmem:[%s229_s20 + $0x4] sm:$0xf] (%p890_p3), %v253_v3  ;;  %v257_v5 = vld [vmem:[%s931_s25 + $0x18] sm:$0xf] (%p890_p3) }
  0x2a   : > { %v259_v6 = vld [vmem:[%s931_s25 + $0x20] sm:$0xf]  ;;  %256 = vst [vmem:[%s229_s20 + $0x8] sm:$0xf] %v255_v4  ;;  %258 = vst [vmem:[%s229_s20 + $0xc] sm:$0xf] %v257_v5 }
  0x2b   : > { %260 = vst [vmem:[%s229_s20 + $0x10] sm:$0xf] %v259_v6  ;;  %v261_v7 = vld [vmem:[%s931_s25 + $0x28] sm:$0xf]  ;;  %v263_v8 = vld [vmem:[%s931_s25 + $0x30] sm:$0xf] }
  0x2c   : > { %v265_v9 = vld [vmem:[%s931_s25 + $0x38] sm:$0xf]  ;;  %262 = vst [vmem:[%s229_s20 + $0x14] sm:$0xf] %v261_v7  ;;  %264 = vst [vmem:[%s229_s20 + $0x18] sm:$0xf] %v263_v8 }
  0x2d   : > { %266 = vst [vmem:[%s229_s20 + $0x1c] sm:$0xf] %v265_v9  ;;  %v267_v10 = vld [vmem:[%s931_s25 + $0x40] sm:$0xf]  ;;  %v269_v11 = vld [vmem:[%s931_s25 + $0x48] sm:$0xf] }
  0x2e   : > { %v271_v12 = vld [vmem:[%s931_s25 + $0x50] sm:$0xf]  ;;  %268 = vst [vmem:[%s229_s20 + $0x20] sm:$0xf] %v267_v10  ;;  %270 = vst [vmem:[%s229_s20 + $0x24] sm:$0xf] %v269_v11 }
  0x2f   : > { %272 = vst [vmem:[%s229_s20 + $0x28] sm:$0xf] %v271_v12  ;;  %v273_v13 = vld [vmem:[%s931_s25 + $0x58] sm:$0xf]  ;;  %v275_v14 = vld [vmem:[%s931_s25 + $0x60] sm:$0xf] }
  0x30   : > { %v277_v15 = vld [vmem:[%s931_s25 + $0x68] sm:$0xf]  ;;  %274 = vst [vmem:[%s229_s20 + $0x2c] sm:$0xf] %v273_v13  ;;  %276 = vst [vmem:[%s229_s20 + $0x30] sm:$0xf] %v275_v14 }
  0x31   : > { %278 = vst [vmem:[%s229_s20 + $0x34] sm:$0xf] %v277_v15  ;;  %v279_v16 = vld [vmem:[%s931_s25 + $0x70] sm:$0xf]  ;;  %v281_v17 = vld [vmem:[%s931_s25 + $0x78] sm:$0xf] }
  0x32   : > { %280 = vst [vmem:[%s229_s20 + $0x38] sm:$0xf] %v279_v16  ;;  %282 = vst [vmem:[%s229_s20 + $0x3c] sm:$0xf] %v281_v17 }
  0x33 PF: > { %341 = sbr.rel (%p898_p7) target bundleno = 324 (0x144), region = 106  ;;  %s344_s26 = sand.u32 (!%p898_p7), 1, %s816_s12  }
  0x34   : > { %s952_s27 = sshll.u32 (!%p898_p7), %s344_s26, 3  ;;  %s668_s28 = sshll.u32 (!%p898_p7), %s344_s26, 6 }
  0x35   : > { %s346_s29 = scalar_lea.vmem (!%p898_p7), [#allocation2], %s952_s27  ;;  %s353_s30 = scalar_lea.vmem (!%p898_p7), [#allocation3], %s668_s28 }
  0x38   : > { %811 = dma.done.wait (%p902_p8), [#allocation5], 16  }
  0x39   : > { %813 = vsyncadd (%p902_p8), [#allocation5], 4294967280 }
  0x3a   : > { %361 = sfence }
  0x3b   : > { %v766_v18 = vld [vmem:[%s353_s30 + $0x38] sm:$0xff]   ;;  %v835_v19 = vmov 0.0   ;;  %vm836_vm0 = vmmov 0   ;;  %v767_v20 = vld [vmem:[%s353_s30 + $0x30] sm:$0xff]   ;;  %v768_v21 = vld [vmem:[%s353_s30 + $0x28] sm:$0xff]   ;;  %p393_p3 = scmp.lt.s32.totalorder %s824_s14, 1 }
  0x3c   : > { %693 = vmatprep.subr.bf16.mxu0 %v835_v19  ;;  %709 = vmatprep.mubr.msk.bf16.mxu0 %vm836_vm0, %v835_v19  ;;  %v769_v22 = vld [vmem:[%s353_s30 + $0x20] sm:$0xff]   ;;  %v770_v23 = vld [vmem:[%s353_s30 + $0x18] sm:$0xff]   ;;  %v771_v24 = vld [vmem:[%s353_s30 + $0x10] sm:$0xff]   ;;  %s424_s12 = sld [smem:[#allocation4 + %s824_s14]] }
  0x3d   : > { %694 = vmatpush3.bf16.xpose.msra.mxu0 %v766_v18  ;;  %v772_v25 = vld [vmem:[%s353_s30 + $0x8] sm:$0xff]   ;;  %v773_v26 = vld [vmem:[%s353_s30] sm:$0xff]   ;;  %v774_v27 = vld [vmem:[%s346_s29] sm:$0xff]   ;;  %s996_s14 = smov (!%p393_p3, %s824_s14), 1 }
  0x3e   : > { %695 = vmatprep.subr.bf16.mxu0 %v835_v19  ;;  %s683_s22 = sshll.u32 %s996_s14, 4 }
  0x3f   : > { %s403_s5 = scalar_lea.vmem %s985_s3, %s683_s22 }
  0x42   : > { %v425_v28 = vstv %s424_s12 }
  0x45   : > { %696 = vmatpush3.bf16.xpose.msra.mxu0 %v767_v20 }
  0x46   : > { %697 = vmatprep.subr.bf16.mxu0 %v835_v19 }
  0x4d   : > { %698 = vmatpush3.bf16.xpose.msra.mxu0 %v768_v21 }
  0x4e   : > { %699 = vmatprep.subr.bf16.mxu0 %v835_v19 }
  0x55   : > { %700 = vmatpush3.bf16.xpose.msra.mxu0 %v769_v22 }
  0x56   : > { %701 = vmatprep.subr.bf16.mxu0 %v835_v19 }
  0x5d   : > { %702 = vmatpush3.bf16.xpose.msra.mxu0 %v770_v23 }
  0x5e   : > { %703 = vmatprep.subr.bf16.mxu0 %v835_v19 }
  0x65   : > { %704 = vmatpush3.bf16.xpose.msra.mxu0 %v771_v24 }
  0x66   : > { %705 = vmatprep.subr.bf16.mxu0 %v835_v19 }
  0x6d   : > { %706 = vmatpush3.bf16.xpose.msra.mxu0 %v772_v25 }
  0x6e   : > { %707 = vmatprep.subr.bf16.mxu0 %v835_v19 }
  0x75   : > { %708 = vmatpush3.bf16.xpose.msra.mxu0 %v773_v26 }
  0x7c   : > { %710 = vmatmul.mubr.bf16.vlgmr.msra.gmra.mxu0 %v774_v27 }
 0x13c   : > { %v514_v29 = vpop.f32.mrf.mxu0 }
 0x13d   : > { %v515_v30 = vadd.f32 %v514_v29, %v425_v28 }
 0x13e   : > { %v711_v31 = vpop.f32.mrf.mxu0 }
 0x13f   : > { %521 = vst [vmem:[%s403_s5] sm:$0xff] %v515_v30 }
 0x140   : > { %v517_v32 = vpop.f32.mrf.mxu0 }
 0x141   : > { %v518_v33 = vadd.f32 %v517_v32, %v425_v28 }
 0x142   : > { %v712_v34 = vpop.f32.mrf.mxu0 }
 0x143   : > { %522 = vst [vmem:[%s403_s5 + $0x8] sm:$0xff] %v518_v33 }
 0x144 PF: > { %s14_s16 = sadd.s32 1, %s832_s16   ;;  %s989_s12 = smov %s820_s13 }
 0x145   : > { %p11_p7 = scmp.ge.s32.totalorder %s14_s16, 4   ;;  %s990_s13 = smov %s907_s24 }
 0x146   : > { %s991_s14 = smov %s828_s15  ;;  %s992_s15 = smov %s994_s18 }
 0x147   :  { %13 = sbr.rel (!%p11_p7) target bundleno = 3 (0x3), region = 162 }
 0x14c   :  { %559 = vsyncpa [#allocation5], 1 }
 0x14d   :  { %561 = vsyncpa [#allocation5 + $0x1], 1 }

// kernel: densedon3d_pallas.4
= control target key start
LH: loop header
LB: loop body
LE: loop exit
PB: predicated region body
PF: predicated region fallthrough
CT: control target
= control target key end

     0   :  { %16 = vsyncpa [#allocation4], 0  ;;  %s2085_s0 = inlined_call_operand.vmem [shape: bf16[64,128], index: 0, kind: input, shape index: {}]   ;;  %s2086_s1 = inlined_call_operand.vmem [shape: bf16[128,128], index: 1, kind: input, shape index: {}]   ;;  %s2087_s2 = inlined_call_operand.vmem [shape: f32[1,128], index: 2, kind: input, shape index: {}]   ;;  %s2088_s3 = inlined_call_operand.hbm [shape: bf16[128,128], index: 3, kind: input, shape index: {}]   ;;  %s2089_s4 = inlined_call_operand.vmem [shape: f32[1,128], index: 4, kind: input, shape index: {}]   ;;  %s2090_s5 = inlined_call_operand.hbm [shape: bf16[128,128], index: 5, kind: input, shape index: {}]   ;;  %s2091_s6 = inlined_call_operand.vmem [shape: f32[1,128], index: 6, kind: input, shape index: {}]   ;;  %s2092_s7 = inlined_call_operand.hbm [shape: bf16[128,128], index: 7, kind: input, shape index: {}]   ;;  %s2093_s8 = inlined_call_operand.vmem [shape: f32[1,128], index: 8, kind: input, shape index: {}]   ;;  %s2094_s9 = inlined_call_operand.vmem [shape: bf16[128,256], index: 9, kind: input, shape index: {}]   ;;  %s2095_s10 = inlined_call_operand.vmem [shape: f32[1,256], index: 10, kind: input, shape index: {}]   ;;  %s2096_s11 = inlined_call_operand.vmem [shape: bf16[64,256], index: 11, kind: output, shape index: {}]  }
   0x1   :  { %17 = vsyncpa [#allocation6], 0  ;;  %s1890_s17 = smov 0   ;;  %s1892_s18 = smov 0  }
   0x2   :  { %s1894_s19 = smov 0  }
   0x3 LB: > { %s1365_s20 = sadd.s32 4294967295, %s1822_s19   ;;  %p1367_p0 = scmp.ge.s32.totalorder %s1822_s19, 1  ;;  %s1822_s19 = sphi %s1894_s19, %s23_s19   ;;  %s1818_s18 = sphi %s1892_s18, %s2102_s18   ;;  %s1814_s17 = sphi %s1890_s17, %s2101_s17  }
   0x4   : > { %p304_p1 = scmp.lt.s32.totalorder %s1822_s19, 3  ;;  %p1908_p2 = scmp.eq.s32.totalorder %s1365_s20, 0 }
   0x5   : > { %s1824_s23 = smov [#allocation5]   ;;  %s35_s26 = sadd.s32 1, %s1818_s18 }
   0x6   : > { %p1912_p3 = pnand %p1367_p0, %p304_p1  ;;  %s338_s24 = sshll.u32 %s1824_s23, 4  ;;  %s339_s24 = int_to_ptr.vmem [resolvable:$true] %s338_s24 }
   0x7   : > { %p1925_p6 = scmp.ge.s32.totalorder %s35_s26, 2  ;;  %s1825_s28 = smov [#allocation3]  }
   0x8   : > { %p1578_p4 = pneg %p1912_p3  ;;  %s322_s29 = sshll.u32 %s1825_s28, 4  ;;  %s323_s29 = int_to_ptr.vmem [resolvable:$true] %s322_s29 }
   0x9   : > { %s1725_s30 = scalar_lea.vmem %s339_s24, 1024  ;;  %p1733_p11 = scmp.lt.s32.totalorder %s339_s24, %s339_s24 }
   0xa   : > { %p1920_p5 = pnand %p1908_p2, %p1578_p4  ;;  %p1726_p8 = scmp.ne.s32.totalorder %s339_s24, %s1725_s30 }
   0xb   : > { %p1734_p12 = scmp.lt.s32.totalorder %s1725_s30, %s1725_s30 }
   0xc   : > { %p1716_p7 = pneg %p1920_p5 }
   0xd   : > { %p1735_p13 = por %p1734_p12, %p1733_p11 }
   0xe   : > { %p1728_p9 = pnand %p1726_p8, %p1716_p7 }
  0x10   : > { %p1729_p10 = pneg %p1728_p9 }
  0x12   : > { %p1736_p0 = pnand %p1735_p13, %p1729_p10 }
  0x14   : > { %1739 = shalt.err (!%p1736_p0)
}
  0x15   : > { %s1826_s12 = smov 64   ;;  %s1827_s13 = smov 4  }
  0x16   : > { %1584 = dma.hbm_to_vmem [thread:$0]  (!%p1920_p5), %s2090_s5, 1024, %s339_s24, [#allocation6], %s1826_s12, %s1826_s12, %s1827_s13  }
  0x17   : > { %s2104_s26 = smov (%p1925_p6, %s35_s26), 0  ;;  %s1751_s16 = scalar_lea.vmem %s323_s29, 1024 }
  0x18   : > { %p1752_p1 = scmp.ne.s32.totalorder %s323_s29, %s1751_s16  ;;  %p1759_p9 = scmp.lt.s32.totalorder %s323_s29, %s323_s29 }
  0x19   : > { %p1760_p10 = scmp.lt.s32.totalorder %s1751_s16, %s1751_s16 }
  0x1a   : > { %p1754_p4 = pnand %p1752_p1, %p1716_p7 }
  0x1b   : > { %p1761_p11 = por %p1760_p10, %p1759_p9 }
  0x1c   : > { %p1755_p8 = pneg %p1754_p4 }
  0x1e   : > { %p1762_p12 = pnand %p1761_p11, %p1755_p8 }
  0x20   : > { %1765 = shalt.err (!%p1762_p12)
}
  0x21   : > { %1581 = dma.hbm_to_vmem [thread:$0]  (!%p1920_p5), %s2088_s3, 1024, %s323_s29, [#allocation4], %s1826_s12, %s1826_s12, %s1827_s13  }
  0x22   : > { %s1828_s24 = smov [#allocation7]  }
  0x23   : > { %s354_s27 = sshll.u32 %s1828_s24, 4  ;;  %s355_s27 = int_to_ptr.vmem [resolvable:$true] %s354_s27 }
  0x24   : > { %s1777_s28 = scalar_lea.vmem %s355_s27, 1024  ;;  %p1785_p1 = scmp.lt.s32.totalorder %s355_s27, %s355_s27 }
  0x25   : > { %p1778_p6 = scmp.ne.s32.totalorder %s355_s27, %s1777_s28  ;;  %p1786_p4 = scmp.lt.s32.totalorder %s1777_s28, %s1777_s28 }
  0x27   : > { %p1780_p13 = pnand %p1778_p6, %p1716_p7  ;;  %p1787_p8 = por %p1786_p4, %p1785_p1 }
  0x29   : > { %p1781_p0 = pneg %p1780_p13 }
  0x2b   : > { %p1788_p9 = pnand %p1787_p8, %p1781_p0 }
  0x2d   : > { %1791 = shalt.err (!%p1788_p9)
}
  0x2e   : > { %1587 = dma.hbm_to_vmem [thread:$0]  (!%p1920_p5), %s2092_s7, 1024, %s355_s27, [#allocation6], %s1826_s12, %s1826_s12, %s1827_s13  }
  0x2f   : > { %391 = sbr.rel (%p1912_p3) target bundleno = 1195 (0x4ab), region = 64 }
  0x34   : > { %1805 = dma.done.wait (%p1908_p2), [#allocation4], 1024  }
  0x35   : > { %1807 = vsyncadd (%p1908_p2), [#allocation4], 4294966272 }
  0x36   : > { %1809 = dma.done.wait (%p1908_p2), [#allocation6], 2048  }
  0x37   : > { %1811 = vsyncadd (%p1908_p2), [#allocation6], 4294965248  ;;  %s1376_s25 = sshll.u32 %s1814_s17, 2  ;;  %v1624_v0 = vld [vmem:[%s2086_s1 + $0x38] sm:$0xff]   ;;  %v1625_v1 = vld [vmem:[%s2086_s1 + $0x30] sm:$0xff]  }
  0x38   : > { %p444_p7 = scmp.lt.s32.totalorder %s1376_s25, 7  ;;  %1486 = vmatprep.subr.bf16.mxu1 %v1624_v0  ;;  %v1626_v2 = vld [vmem:[%s2086_s1 + $0x28] sm:$0xff]   ;;  %v1627_v3 = vld [vmem:[%s2086_s1 + $0x20] sm:$0xff]   ;;  %v1628_v5 = vld [vmem:[%s2086_s1 + $0x18] sm:$0xff]  }
  0x39   : > { %1487 = vmatpush3.bf16.msra.mxu1 %v1624_v0  ;;  %v1629_v6 = vld [vmem:[%s2086_s1 + $0x10] sm:$0xff]   ;;  %v1630_v7 = vld [vmem:[%s2086_s1 + $0x8] sm:$0xff]   ;;  %v1631_v8 = vld [vmem:[%s2086_s1] sm:$0xff]  }
  0x3a   : > { %s2106_s25 = smov (!%p444_p7, %s1376_s25), 7  ;;  %1488 = vmatprep.subr.bf16.mxu1 %v1625_v1  ;;  %v1634_v10 = vld [vmem:[#allocation3 + $0x38] sm:$0xff]   ;;  %v1635_v11 = vld [vmem:[#allocation3 + $0x30] sm:$0xff]   ;;  %v1636_v12 = vld [vmem:[#allocation3 + $0x28] sm:$0xff]  }
  0x3b   : > { %s1377_s15 = sshll.u32 %s2106_s25, 2  ;;  %v1637_v13 = vld [vmem:[#allocation3 + $0x20] sm:$0xff]   ;;  %v1638_v14 = vld [vmem:[#allocation3 + $0x18] sm:$0xff]   ;;  %v1639_v15 = vld [vmem:[#allocation3 + $0x10] sm:$0xff]   ;;  %s1441_s13 = sshll.u32 %s2106_s25, 3 }
  0x3c   : > { %s450_s23 = scalar_lea.vmem %s2085_s0, %s1377_s15  ;;  %v1640_v16 = vld [vmem:[#allocation3 + $0x8] sm:$0xff]   ;;  %v1641_v17 = vld [vmem:[#allocation3] sm:$0xff]   ;;  %v1642_v49 = vld [vmem:[#allocation5 + $0x38] sm:$0xff]   ;;  %s457_s21 = scalar_lea.vmem %s2096_s11, %s1441_s13 }
  0x3d   : > { %1489 = vmatpush3.bf16.msra.mxu1 %v1625_v1  ;;  %v1632_v4 = vld [vmem:[%s450_s23] sm:$0xff]   ;;  %v1633_v9 = vld [vmem:[%s450_s23 + $0x8] sm:$0xff]   ;;  %1526 = vmatprep.subr.bf16.mxu0 %v1642_v49  ;;  %v1643_v50 = vld [vmem:[#allocation5 + $0x30] sm:$0xff]  }
  0x3e   : > { %1490 = vmatprep.subr.bf16.mxu1 %v1626_v2  ;;  %1502 = vmatprep.mubr.bf16.mxu1 %v1632_v4  ;;  %v1391_v18 = vld [vmem:[%s2087_s2] ss:$0 sm:$0xff]  ;;  %v1644_v51 = vld [vmem:[#allocation5 + $0x28] sm:$0xff]   ;;  %v1646_v53 = vld [vmem:[#allocation5 + $0x18] sm:$0xff]  }
  0x3f   : > { %1527 = vmatpush3.bf16.msra.mxu0 %v1642_v49  ;;  %v1645_v52 = vld [vmem:[#allocation5 + $0x20] sm:$0xff]   ;;  %v1647_v54 = vld [vmem:[#allocation5 + $0x10] sm:$0xff]   ;;  %v1648_v55 = vld [vmem:[#allocation5 + $0x8] sm:$0xff]  }
  0x40   : > { %1528 = vmatprep.subr.bf16.mxu0 %v1643_v50  ;;  %v1649_v56 = vld [vmem:[#allocation5] sm:$0xff]  }
  0x41   : > { %1491 = vmatpush3.bf16.msra.mxu1 %v1626_v2  ;;  %v1392_v57 = vld [vmem:[%s2089_s4] ss:$0 sm:$0xff] }
  0x42   : > { %1492 = vmatprep.subr.bf16.mxu1 %v1627_v3 }
  0x43   : > { %1529 = vmatpush3.bf16.msra.mxu0 %v1643_v50 }
  0x44   : > { %1530 = vmatprep.subr.bf16.mxu0 %v1644_v51 }
  0x45   : > { %1493 = vmatpush3.bf16.msra.mxu1 %v1627_v3 }
  0x46   : > { %1494 = vmatprep.subr.bf16.mxu1 %v1628_v5 }
  0x47   : > { %1531 = vmatpush3.bf16.msra.mxu0 %v1644_v51 }
  0x48   : > { %1532 = vmatprep.subr.bf16.mxu0 %v1645_v52 }
  0x49   : > { %1495 = vmatpush3.bf16.msra.mxu1 %v1628_v5 }
  0x4a   : > { %1496 = vmatprep.subr.bf16.mxu1 %v1629_v6 }
  0x4b   : > { %1533 = vmatpush3.bf16.msra.mxu0 %v1645_v52 }
  0x4c   : > { %1534 = vmatprep.subr.bf16.mxu0 %v1646_v53 }
  0x4d   : > { %1497 = vmatpush3.bf16.msra.mxu1 %v1629_v6 }
  0x4e   : > { %1498 = vmatprep.subr.bf16.mxu1 %v1630_v7 }
  0x4f   : > { %1535 = vmatpush3.bf16.msra.mxu0 %v1646_v53 }
  0x50   : > { %1536 = vmatprep.subr.bf16.mxu0 %v1647_v54 }
  0x51   : > { %1499 = vmatpush3.bf16.msra.mxu1 %v1630_v7 }
  0x52   : > { %1500 = vmatprep.subr.bf16.mxu1 %v1631_v8 }
  0x53   : > { %1537 = vmatpush3.bf16.msra.mxu0 %v1647_v54 }
  0x54   : > { %1538 = vmatprep.subr.bf16.mxu0 %v1648_v55 }
  0x55   : > { %1501 = vmatpush3.bf16.msra.mxu1 %v1631_v8 }
  0x56   : > { %1506 = vmatprep.subr.bf16.mxu1 %v1634_v10 }
  0x57   : > { %1539 = vmatpush3.bf16.msra.mxu0 %v1648_v55 }
  0x58   : > { %1503 = vmatmul.mubr.bf16.vlgmr.msra.gmra.mxu1 %v1633_v9  ;;  %1540 = vmatprep.subr.bf16.mxu0 %v1649_v56 }
  0x59   : > { %1507 = vmatpush3.bf16.msra.mxu1 %v1634_v10 }
  0x5a   : > { %1508 = vmatprep.subr.bf16.mxu1 %v1635_v11 }
  0x5b   : > { %1541 = vmatpush3.bf16.msra.mxu0 %v1649_v56 }
  0x5d   : > { %1509 = vmatpush3.bf16.msra.mxu1 %v1635_v11 }
  0x5e   : > { %1510 = vmatprep.subr.bf16.mxu1 %v1636_v12 }
  0x61   : > { %1511 = vmatpush3.bf16.msra.mxu1 %v1636_v12 }
  0x62   : > { %1512 = vmatprep.subr.bf16.mxu1 %v1637_v13 }
  0x65   : > { %1513 = vmatpush3.bf16.msra.mxu1 %v1637_v13 }
  0x66   : > { %1514 = vmatprep.subr.bf16.mxu1 %v1638_v14 }
  0x69   : > { %1515 = vmatpush3.bf16.msra.mxu1 %v1638_v14 }
  0x6a   : > { %1516 = vmatprep.subr.bf16.mxu1 %v1639_v15 }
  0x6d   : > { %1517 = vmatpush3.bf16.msra.mxu1 %v1639_v15 }
  0x6e   : > { %1518 = vmatprep.subr.bf16.mxu1 %v1640_v16 }
  0x71   : > { %1519 = vmatpush3.bf16.msra.mxu1 %v1640_v16 }
  0x72   : > { %1520 = vmatprep.subr.bf16.mxu1 %v1641_v17 }
  0x75   : > { %1521 = vmatpush3.bf16.msra.mxu1 %v1641_v17 }
 0x118   : > { %v1504_v19 = vpop.f32.mrf.mxu1 }
 0x119   : > { %v625_v20 = vadd.f32 %v1504_v19, %v1391_v18 }
 0x11a   : > { %v586_v21 = vpop.f32.mrf.mxu1 }
 0x11b   : > { %v623_v22 = vadd.f32 %v1391_v18, %v586_v21  ;;  %v633_v23 = vmul.f32 0.70710677, %v625_v20  ;;  %v629_v42 = vmul.f32 0.5, %v625_v20 }
 0x11c   : > { %v1505_v24 = vpop.f32.mrf.mxu1 }
 0x11d   : > { %v631_v25 = vmul.f32 0.70710677, %v623_v22  ;;  %v626_v26 = vadd.f32 %v1505_v24, %v1391_v18  ;;  %v627_v39 = vmul.f32 0.5, %v623_v22  ;;  %v1650_v24 = vld [vmem:[#allocation7 + $0x38] sm:$0xff]  }
 0x11e   : > { %v589_v27 = vpop.f32.mrf.mxu1  ;;  %1546 = vmatprep.subr.bf16.mxu1 %v1650_v24 }
 0x11f   : > { %1682 = verf.f32 %v631_v25  ;;  %v634_v28 = vmul.f32 0.70710677, %v626_v26  ;;  %v624_v29 = vadd.f32 %v1391_v18, %v589_v27  ;;  %v630_v38 = vmul.f32 0.5, %v626_v26  ;;  %v1651_v25 = vld [vmem:[#allocation7 + $0x30] sm:$0xff]   ;;  %v1652_v26 = vld [vmem:[#allocation7 + $0x28] sm:$0xff]   ;;  %v1653_v27 = vld [vmem:[#allocation7 + $0x20] sm:$0xff]  }
 0x120   : > { %1684 = verf.f32 %v633_v23 }
 0x121   : > { %1686 = verf.f32 %v634_v28  ;;  %v632_v30 = vmul.f32 0.70710677, %v624_v29  ;;  %v628_v40 = vmul.f32 0.5, %v624_v29  ;;  %v1654_v28 = vld [vmem:[#allocation7 + $0x18] sm:$0xff]   ;;  %v1655_v29 = vld [vmem:[#allocation7 + $0x10] sm:$0xff]  }
 0x123   : > { %1688 = verf.f32 %v632_v30  ;;  %v1656_v30 = vld [vmem:[#allocation7 + $0x8] sm:$0xff]  }
 0x12c   : > { %v1683_v31 = vpop.eup %1682 }
 0x12d   : > { %v1685_v32 = vpop.eup %1684  ;;  %v639_v34 = vadd.f32 1.0, %v1683_v31  ;;  %v1657_v31 = vld [vmem:[#allocation7] sm:$0xff]  }
 0x12e   : > { %v1687_v33 = vpop.eup %1686  ;;  %v641_v37 = vadd.f32 1.0, %v1685_v32  ;;  %v1658_v32 = vld [vmem:[%s2094_s9 + $0x70] ss:$8 sps:$4 sm:$0xff]  }
 0x12f   : > { %v642_v35 = vadd.f32 1.0, %v1687_v33  ;;  %v643_v44 = vmul.f32 %v639_v34, %v627_v39  ;;  %v1660_v33 = vld [vmem:[%s2094_s9 + $0x74] ss:$8 sps:$4 sm:$0xff]   ;;  %v1401_v34 = vld [vmem:[%s2091_s6] ss:$0 sm:$0xff] }
 0x130   : > { %v1689_v36 = vpop.eup %1688  ;;  %v645_v46 = vmul.f32 %v641_v37, %v629_v42  ;;  %1183 = vmatprep.subr.bf16.mxu0 %v1660_v33 }
 0x131   : > { %v640_v41 = vadd.f32 1.0, %v1689_v36  ;;  %v646_v43 = vmul.f32 %v642_v35, %v630_v38 }
 0x133   : > { %v644_v45 = vmul.f32 %v640_v41, %v628_v40  ;;  %v665_v48 = vpack.c.bf16 %v646_v43, %v645_v46 }
 0x135   : > { %v664_v47 = vpack.c.bf16 %v644_v45, %v643_v44 }
 0x137   : > { %1522 = vmatprep.mubr.bf16.mxu1 %v664_v47 }
 0x138   : > { %1523 = vmatmul.mubr.bf16.vlgmr.msra.gmra.mxu1 %v665_v48 }
 0x139   : > { %1547 = vmatpush3.bf16.msra.mxu1 %v1650_v24 }
 0x13a   : > { %1548 = vmatprep.subr.bf16.mxu1 %v1651_v25 }
 0x13d   : > { %1549 = vmatpush3.bf16.msra.mxu1 %v1651_v25 }
 0x13e   : > { %1550 = vmatprep.subr.bf16.mxu1 %v1652_v26 }
 0x141   : > { %1551 = vmatpush3.bf16.msra.mxu1 %v1652_v26 }
 0x142   : > { %1552 = vmatprep.subr.bf16.mxu1 %v1653_v27 }
 0x145   : > { %1553 = vmatpush3.bf16.msra.mxu1 %v1653_v27 }
 0x146   : > { %1554 = vmatprep.subr.bf16.mxu1 %v1654_v28 }
 0x149   : > { %1555 = vmatpush3.bf16.msra.mxu1 %v1654_v28 }
 0x14a   : > { %1556 = vmatprep.subr.bf16.mxu1 %v1655_v29 }
 0x14d   : > { %1557 = vmatpush3.bf16.msra.mxu1 %v1655_v29 }
 0x14e   : > { %1558 = vmatprep.subr.bf16.mxu1 %v1656_v30 }
 0x151   : > { %1559 = vmatpush3.bf16.msra.mxu1 %v1656_v30 }
 0x152   : > { %1560 = vmatprep.subr.bf16.mxu1 %v1657_v31 }
 0x155   : > { %1561 = vmatpush3.bf16.msra.mxu1 %v1657_v31 }
 0x1f8   : > { %v1524_v58 = vpop.f32.mrf.mxu1 }
 0x1f9   : > { %v763_v59 = vadd.f32 %v1524_v58, %v1392_v57 }
 0x1fa   : > { %v754_v60 = vpop.f32.mrf.mxu1 }
 0x1fb   : > { %v755_v61 = vadd.f32 %v1392_v57, %v754_v60  ;;  %v775_v62 = vmul.f32 0.70710677, %v763_v59  ;;  %v771_v17 = vmul.f32 0.5, %v763_v59 }
 0x1fc   : > { %v1525_v63 = vpop.f32.mrf.mxu1 }
 0x1fd   : > { %v773_v0 = vmul.f32 0.70710677, %v755_v61  ;;  %v766_v1 = vadd.f32 %v1525_v63, %v1392_v57  ;;  %v769_v14 = vmul.f32 0.5, %v755_v61 }
 0x1fe   : > { %v757_v2 = vpop.f32.mrf.mxu1 }
 0x1ff   : > { %1690 = verf.f32 %v773_v0  ;;  %v776_v3 = vmul.f32 0.70710677, %v766_v1  ;;  %v758_v4 = vadd.f32 %v1392_v57, %v757_v2  ;;  %v772_v13 = vmul.f32 0.5, %v766_v1  ;;  %v1663_v1 = vld [vmem:[%s2094_s9 + $0x64] ss:$8 sps:$4 sm:$0xff]  }
 0x200   : > { %1692 = verf.f32 %v775_v62  ;;  %v1661_v2 = vld [vmem:[%s2094_s9 + $0x60] ss:$8 sps:$4 sm:$0xff]  }
 0x201   : > { %1694 = verf.f32 %v776_v3  ;;  %v774_v5 = vmul.f32 0.70710677, %v758_v4  ;;  %v770_v15 = vmul.f32 0.5, %v758_v4  ;;  %v1666_v3 = vld [vmem:[%s2094_s9 + $0x54] ss:$8 sps:$4 sm:$0xff]  }
 0x202   : > { %v1664_v4 = vld [vmem:[%s2094_s9 + $0x50] ss:$8 sps:$4 sm:$0xff]  }
 0x203   : > { %1696 = verf.f32 %v774_v5  ;;  %v1669_v5 = vld [vmem:[%s2094_s9 + $0x44] ss:$8 sps:$4 sm:$0xff]  }
 0x20c   : > { %v1691_v6 = vpop.eup %1690 }
 0x20d   : > { %v1693_v7 = vpop.eup %1692  ;;  %v781_v10 = vadd.f32 1.0, %v1691_v6  ;;  %v1667_v6 = vld [vmem:[%s2094_s9 + $0x40] ss:$8 sps:$4 sm:$0xff]  }
 0x20e   : > { %v1695_v8 = vpop.eup %1694  ;;  %v783_v12 = vadd.f32 1.0, %v1693_v7  ;;  %v1672_v7 = vld [vmem:[%s2094_s9 + $0x34] ss:$8 sps:$4 sm:$0xff]  }
 0x20f   : > { %v784_v9 = vadd.f32 1.0, %v1695_v8  ;;  %v785_v19 = vmul.f32 %v781_v10, %v769_v14  ;;  %v1670_v8 = vld [vmem:[%s2094_s9 + $0x30] ss:$8 sps:$4 sm:$0xff]   ;;  %v1673_v10 = vld [vmem:[%s2094_s9 + $0x20] ss:$8 sps:$4 sm:$0xff]  }
 0x210   : > { %v1697_v11 = vpop.eup %1696  ;;  %v787_v21 = vmul.f32 %v783_v12, %v771_v17  ;;  %v1676_v12 = vld [vmem:[%s2094_s9 + $0x10] ss:$8 sps:$4 sm:$0xff]   ;;  %v1679_v14 = vld [vmem:[%s2094_s9] ss:$8 sps:$4 sm:$0xff]  }
 0x211   : > { %v782_v16 = vadd.f32 1.0, %v1697_v11  ;;  %v788_v18 = vmul.f32 %v784_v9, %v772_v13  ;;  %v1675_v9 = vld [vmem:[%s2094_s9 + $0x24] ss:$8 sps:$4 sm:$0xff]   ;;  %v1678_v11 = vld [vmem:[%s2094_s9 + $0x14] ss:$8 sps:$4 sm:$0xff]  }
 0x212   : > { %v1681_v13 = vld [vmem:[%s2094_s9 + $0x4] ss:$8 sps:$4 sm:$0xff]   ;;  %v1410_v17 = vld [vmem:[%s2093_s8] ss:$0 sm:$0xff] }
 0x213   : > { %v786_v20 = vmul.f32 %v782_v16, %v770_v15  ;;  %v807_v23 = vpack.c.bf16 %v788_v18, %v787_v21  ;;  %v1829_v15 = vmov 0  }
 0x215   : > { %v806_v22 = vpack.c.bf16 %v786_v20, %v785_v19 }
 0x217   : > { %1542 = vmatprep.mubr.bf16.mxu0 %v806_v22 }
 0x218   : > { %1543 = vmatmul.mubr.bf16.vlgmr.msra.gmra.mxu0 %v807_v23 }
 0x219   : > { %1184 = vmatpush1.bf16.msra.mxu0 %v1658_v32  ;;  %1215 = vmatprep.mubr.bf16.mxu0 %v1829_v15 }
 0x21a   : > { %1185 = vmatprep.subr.bf16.mxu0 %v1663_v1 }
 0x21d   : > { %1186 = vmatpush1.bf16.msra.mxu0 %v1661_v2 }
 0x21e   : > { %1187 = vmatprep.subr.bf16.mxu0 %v1666_v3 }
 0x221   : > { %1188 = vmatpush1.bf16.msra.mxu0 %v1664_v4 }
 0x222   : > { %1189 = vmatprep.subr.bf16.mxu0 %v1669_v5 }
 0x225   : > { %1190 = vmatpush1.bf16.msra.mxu0 %v1667_v6 }
 0x226   : > { %1191 = vmatprep.subr.bf16.mxu0 %v1672_v7 }
 0x229   : > { %1192 = vmatpush1.bf16.msra.mxu0 %v1670_v8 }
 0x22a   : > { %1193 = vmatprep.subr.bf16.mxu0 %v1675_v9 }
 0x22d   : > { %1194 = vmatpush1.bf16.msra.mxu0 %v1673_v10 }
 0x22e   : > { %1195 = vmatprep.subr.bf16.mxu0 %v1678_v11 }
 0x231   : > { %1196 = vmatpush1.bf16.msra.mxu0 %v1676_v12 }
 0x232   : > { %1197 = vmatprep.subr.bf16.mxu0 %v1681_v13 }
 0x235   : > { %1198 = vmatpush1.bf16.msra.mxu0 %v1679_v14 }
 0x2d8   : > { %v1544_v35 = vpop.f32.mrf.mxu0 }
 0x2d9   : > { %v905_v36 = vadd.f32 %v1544_v35, %v1401_v34 }
 0x2da   : > { %v896_v37 = vpop.f32.mrf.mxu0 }
 0x2db   : > { %v897_v38 = vadd.f32 %v1401_v34, %v896_v37  ;;  %v917_v39 = vmul.f32 0.70710677, %v905_v36  ;;  %v913_v58 = vmul.f32 0.5, %v905_v36 }
 0x2dc   : > { %v1545_v40 = vpop.f32.mrf.mxu0 }
 0x2dd   : > { %v915_v41 = vmul.f32 0.70710677, %v897_v38  ;;  %v908_v42 = vadd.f32 %v1545_v40, %v1401_v34  ;;  %v911_v55 = vmul.f32 0.5, %v897_v38 }
 0x2de   : > { %v899_v43 = vpop.f32.mrf.mxu0 }
 0x2df   : > { %1698 = verf.f32 %v915_v41  ;;  %v918_v44 = vmul.f32 0.70710677, %v908_v42  ;;  %v900_v45 = vadd.f32 %v1401_v34, %v899_v43  ;;  %v914_v54 = vmul.f32 0.5, %v908_v42 }
 0x2e0   : > { %1700 = verf.f32 %v917_v39 }
 0x2e1   : > { %1702 = verf.f32 %v918_v44  ;;  %v916_v46 = vmul.f32 0.70710677, %v900_v45  ;;  %v912_v56 = vmul.f32 0.5, %v900_v45 }
 0x2e3   : > { %1704 = verf.f32 %v916_v46 }
 0x2ec   : > { %v1699_v47 = vpop.eup %1698 }
 0x2ed   : > { %v1701_v48 = vpop.eup %1700  ;;  %v923_v50 = vadd.f32 1.0, %v1699_v47  ;;  %v1093_v47 = vlaneseq }
 0x2ee   : > { %v1703_v49 = vpop.eup %1702  ;;  %v925_v53 = vadd.f32 1.0, %v1701_v48 }
 0x2ef   : > { %v926_v51 = vadd.f32 1.0, %v1703_v49  ;;  %v927_v60 = vmul.f32 %v923_v50, %v911_v55  ;;  %v1094_v48 = vshrl.u32 %v1093_v47, 7 }
 0x2f0   : > { %v1705_v52 = vpop.eup %1704  ;;  %v929_v62 = vmul.f32 %v925_v53, %v913_v58 }
 0x2f1   : > { %v924_v57 = vadd.f32 1.0, %v1705_v52  ;;  %v930_v59 = vmul.f32 %v926_v51, %v914_v54  ;;  %v1095_v49 = vsub.s32 0, %v1094_v48  ;;  %v1099_v50 = vsub.s32 1, %v1094_v48  ;;  %v1089_v51 = vld [vmem:[%s2095_s10] sm:$0x3] }
 0x2f3   : > { %v928_v61 = vmul.f32 %v924_v57, %v912_v56  ;;  %v949_v0 = vpack.c.bf16 %v930_v59, %v929_v62  ;;  %v1096_v52 = vrot.slane %v1089_v51, %v1095_v49  ;;  %v1100_v53 = vrot.slane %v1089_v51, %v1099_v50 }
 0x2f5   : > { %v948_v63 = vpack.c.bf16 %v928_v61, %v927_v60 }
 0x2f7   : > { %1562 = vmatprep.mubr.bf16.mxu1 %v948_v63 }
 0x2f8   : > { %1563 = vmatmul.mubr.bf16.vlgmr.msra.gmra.mxu1 %v949_v0 }
 0x3b8   : > { %v1564_v16 = vpop.f32.mrf.mxu1 }
 0x3b9   : > { %v1047_v24 = vadd.f32 %v1564_v16, %v1410_v17 }
 0x3ba   : > { %v1038_v18 = vpop.f32.mrf.mxu1 }
 0x3bb   : > { %v1039_v19 = vadd.f32 %v1410_v17, %v1038_v18  ;;  %v1059_v28 = vmul.f32 0.70710677, %v1047_v24  ;;  %v1055_v43 = vmul.f32 0.5, %v1047_v24 }
 0x3bc   : > { %v1565_v20 = vpop.f32.mrf.mxu1 }
 0x3bd   : > { %v1057_v21 = vmul.f32 0.70710677, %v1039_v19  ;;  %v1050_v22 = vadd.f32 %v1565_v20, %v1410_v17  ;;  %v1053_v32 = vmul.f32 0.5, %v1039_v19 }
 0x3be   : > { %v1041_v23 = vpop.f32.mrf.mxu1 }
 0x3bf   : > { %1706 = verf.f32 %v1057_v21  ;;  %v1042_v25 = vadd.f32 %v1410_v17, %v1041_v23  ;;  %v1060_v26 = vmul.f32 0.70710677, %v1050_v22  ;;  %v1056_v42 = vmul.f32 0.5, %v1050_v22 }
 0x3c1   : > { %v1058_v27 = vmul.f32 0.70710677, %v1042_v25  ;;  %v1054_v33 = vmul.f32 0.5, %v1042_v25 }
 0x3c3   : > { %1708 = verf.f32 %v1058_v27 }
 0x3c4   : > { %1710 = verf.f32 %v1060_v26 }
 0x3c5   : > { %1712 = verf.f32 %v1059_v28 }
 0x3cc   : > { %v1707_v29 = vpop.eup %1706 }
 0x3cd   : > { %v1065_v30 = vadd.f32 1.0, %v1707_v29 }
 0x3cf   : > { %v1069_v36 = vmul.f32 %v1065_v30, %v1053_v32 }
 0x3d0   : > { %v1709_v31 = vpop.eup %1708 }
 0x3d1   : > { %v1066_v34 = vadd.f32 1.0, %v1709_v31  ;;  %v1711_v35 = vpop.eup %1710 }
 0x3d2   : > { %v1713_v38 = vpop.eup %1712  ;;  %v1068_v39 = vadd.f32 1.0, %v1711_v35 }
 0x3d3   : > { %v1070_v37 = vmul.f32 %v1066_v34, %v1054_v33  ;;  %v1067_v41 = vadd.f32 1.0, %v1713_v38 }
 0x3d4   : > { %v1072_v44 = vmul.f32 %v1068_v39, %v1056_v42 }
 0x3d5   : > { %v1090_v40 = vpack.c.bf16 %v1070_v37, %v1069_v36  ;;  %v1071_v45 = vmul.f32 %v1067_v41, %v1055_v43 }
 0x3d7   : > { %1216 = vmatmul.mubr.bf16.vlgmr.msra.gmra.mxu0 %v1090_v40  ;;  %v1091_v46 = vpack.c.bf16 %v1072_v44, %v1071_v45 }
 0x3d8   : > { %1225 = vmatprep.mubr.bf16.mxu0 %v1829_v15 }
 0x3df   : > { %1226 = vmatmul.mubr.bf16.gmra.mxu0 %v1091_v46 }
 0x497   : > { %v1217_v54 = vpop.f32.mrf.mxu0 }
 0x498   : > { %v1218_v56 = vadd.f32 %v1217_v54, %v1096_v52 }
 0x499   : > { %v1219_v55 = vpop.f32.mrf.mxu0 }
 0x49a   : > { %v1220_v57 = vadd.f32 %v1219_v55, %v1100_v53 }
 0x49b   : > { %v1221_v58 = vpop.f32.mrf.mxu0 }
 0x49c   : > { %v1442_v59 = vpack.c.bf16 %v1220_v57, %v1218_v56  ;;  %v1222_v61 = vadd.f32 %v1221_v58, %v1096_v52 }
 0x49d   : > { %v1223_v60 = vpop.f32.mrf.mxu0 }
 0x49e   : > { %1260 = vst [vmem:[%s457_s21] sm:$0xff] %v1442_v59  ;;  %v1224_v62 = vadd.f32 %v1223_v60, %v1100_v53 }
 0x49f   : > { %v1227_v63 = vpop.f32.mrf.mxu0 }
 0x4a0   : > { %v1443_v0 = vpack.c.bf16 %v1224_v62, %v1222_v61  ;;  %v1228_v2 = vadd.f32 %v1227_v63, %v1096_v52 }
 0x4a1   : > { %v1229_v1 = vpop.f32.mrf.mxu0 }
 0x4a2   : > { %1261 = vst [vmem:[%s457_s21 + $0x8] sm:$0xff] %v1443_v0  ;;  %v1230_v3 = vadd.f32 %v1229_v1, %v1100_v53 }
 0x4a3   : > { %v1231_v4 = vpop.f32.mrf.mxu0 }
 0x4a4   : > { %v1444_v5 = vpack.c.bf16 %v1230_v3, %v1228_v2  ;;  %v1232_v7 = vadd.f32 %v1231_v4, %v1096_v52 }
 0x4a5   : > { %v1233_v6 = vpop.f32.mrf.mxu0 }
 0x4a6   : > { %1262 = vst [vmem:[%s457_s21 + $0x10] sm:$0xff] %v1444_v5  ;;  %v1234_v8 = vadd.f32 %v1233_v6, %v1100_v53 }
 0x4a8   : > { %v1445_v9 = vpack.c.bf16 %v1234_v8, %v1232_v7 }
 0x4aa   : > { %1263 = vst [vmem:[%s457_s21 + $0x18] sm:$0xff] %v1445_v9 }
 0x4ab PF: > { %s23_s19 = sadd.s32 1, %s1822_s19   ;;  %s2101_s17 = smov %s1818_s18 }
 0x4ac   : > { %p20_p2 = scmp.ge.s32.totalorder %s23_s19, 4   ;;  %s2102_s18 = smov %s2104_s26 }
 0x4ae   :  { %22 = sbr.rel (!%p20_p2) target bundleno = 3 (0x3), region = 115 }
 0x4b3   :  { %1288 = vsyncpa [#allocation4], 1 }
 0x4b4   :  { %1290 = vsyncpa [#allocation4 + $0x1], 1 }
 0x4b5   :  { %1291 = vsyncpa [#allocation6], 1 }

// kernel: densedon3d_pallas.3
= control target key start
LH: loop header
LB: loop body
LE: loop exit
PB: predicated region body
PF: predicated region fallthrough
CT: control target
= control target key end

     0   :  { %v976_v0 = vmov 0.0   ;;  %vm977_vm0 = vmmov 0   ;;  %s1247_s1 = inlined_call_operand.vmem [shape: bf16[128,128], index: 1, kind: input, shape index: {}]   ;;  %s1248_s3 = inlined_call_operand.vmem [shape: bf16[128,128], index: 3, kind: input, shape index: {}]   ;;  %s1249_s0 = inlined_call_operand.vmem [shape: bf16[16,128], index: 0, kind: input, shape index: {}]   ;;  %s1250_s5 = inlined_call_operand.vmem [shape: bf16[128,128], index: 5, kind: input, shape index: {}]   ;;  %s1251_s2 = inlined_call_operand.vmem [shape: f32[1,128], index: 2, kind: input, shape index: {}]   ;;  %s1252_s7 = inlined_call_operand.vmem [shape: bf16[128,128], index: 7, kind: input, shape index: {}]   ;;  %s1253_s4 = inlined_call_operand.vmem [shape: f32[1,128], index: 4, kind: input, shape index: {}]   ;;  %s1254_s9 = inlined_call_operand.vmem [shape: bf16[128,256], index: 9, kind: input, shape index: {}]   ;;  %s1255_s6 = inlined_call_operand.vmem [shape: f32[1,128], index: 6, kind: input, shape index: {}]   ;;  %s1256_s8 = inlined_call_operand.vmem [shape: f32[1,128], index: 8, kind: input, shape index: {}]   ;;  %s1257_s10 = inlined_call_operand.vmem [shape: f32[1,256], index: 10, kind: input, shape index: {}]   ;;  %s1258_s11 = inlined_call_operand.vmem [shape: bf16[16,256], index: 11, kind: output, shape index: {}]  }
   0x1   :  { %820 = vmatprep.subr.bf16.mxu0 %v976_v0  ;;  %v903_v1 = vld [vmem:[%s1247_s1 + $0x38] sm:$0xff]   ;;  %836 = vmatprep.mubr.msk.bf16.mxu0 %vm977_vm0, %v976_v0  ;;  %v904_v2 = vld [vmem:[%s1247_s1 + $0x30] sm:$0xff]   ;;  %v905_v3 = vld [vmem:[%s1247_s1 + $0x28] sm:$0xff]  }
   0x2   :  { %840 = vmatprep.subr.bf16.mxu1 %v976_v0  ;;  %856 = vmatprep.mubr.msk.bf16.mxu1 %vm977_vm0, %v976_v0  ;;  %v906_v4 = vld [vmem:[%s1247_s1 + $0x20] sm:$0xff]   ;;  %v912_v5 = vld [vmem:[%s1248_s3 + $0x38] sm:$0xff]   ;;  %v908_v7 = vld [vmem:[%s1247_s1 + $0x10] sm:$0xff]  }
   0x3   :  { %821 = vmatpush3.bf16.msra.mxu0 %v903_v1  ;;  %841 = vmatpush3.bf16.msra.mxu1 %v912_v5  ;;  %v907_v6 = vld [vmem:[%s1247_s1 + $0x18] sm:$0xff]   ;;  %v909_v8 = vld [vmem:[%s1247_s1 + $0x8] sm:$0xff]   ;;  %v910_v9 = vld [vmem:[%s1247_s1] sm:$0xff]  }
   0x4   :  { %822 = vmatprep.subr.bf16.mxu0 %v976_v0  ;;  %842 = vmatprep.subr.bf16.mxu1 %v976_v0  ;;  %v911_v10 = vld [vmem:[%s1249_s0] sm:$0xff]   ;;  %v913_v11 = vld [vmem:[%s1248_s3 + $0x30] sm:$0xff]   ;;  %v914_v12 = vld [vmem:[%s1248_s3 + $0x28] sm:$0xff]  }
   0x5   :  { %v915_v13 = vld [vmem:[%s1248_s3 + $0x20] sm:$0xff]   ;;  %v916_v14 = vld [vmem:[%s1248_s3 + $0x18] sm:$0xff]   ;;  %v917_v15 = vld [vmem:[%s1248_s3 + $0x10] sm:$0xff]  }
   0x6   :  { %v918_v16 = vld [vmem:[%s1248_s3 + $0x8] sm:$0xff]   ;;  %v919_v17 = vld [vmem:[%s1248_s3] sm:$0xff]   ;;  %v920_v18 = vld [vmem:[%s1250_s5 + $0x38] sm:$0xff]  }
   0x7   :  { %823 = vmatpush3.bf16.msra.mxu0 %v904_v2  ;;  %843 = vmatpush3.bf16.msra.mxu1 %v913_v11  ;;  %v736_v19 = vld [vmem:[%s1251_s2] ss:$0 sm:$0xff]  ;;  %v921_v37 = vld [vmem:[%s1250_s5 + $0x30] sm:$0xff]   ;;  %v922_v38 = vld [vmem:[%s1250_s5 + $0x28] sm:$0xff]  }
   0x8   :  { %824 = vmatprep.subr.bf16.mxu0 %v976_v0  ;;  %844 = vmatprep.subr.bf16.mxu1 %v976_v0  ;;  %v923_v39 = vld [vmem:[%s1250_s5 + $0x20] sm:$0xff]   ;;  %v924_v40 = vld [vmem:[%s1250_s5 + $0x18] sm:$0xff]   ;;  %v925_v41 = vld [vmem:[%s1250_s5 + $0x10] sm:$0xff]  }
   0x9   :  { %v926_v42 = vld [vmem:[%s1250_s5 + $0x8] sm:$0xff]   ;;  %v927_v43 = vld [vmem:[%s1250_s5] sm:$0xff]   ;;  %v928_v44 = vld [vmem:[%s1252_s7 + $0x38] sm:$0xff]  }
   0xa   :  { %v737_v45 = vld [vmem:[%s1253_s4] ss:$0 sm:$0xff]  ;;  %v929_v63 = vld [vmem:[%s1252_s7 + $0x30] sm:$0xff]   ;;  %v930_v1 = vld [vmem:[%s1252_s7 + $0x28] sm:$0xff]  }
   0xb   :  { %825 = vmatpush3.bf16.msra.mxu0 %v905_v3  ;;  %845 = vmatpush3.bf16.msra.mxu1 %v914_v12  ;;  %v931_v2 = vld [vmem:[%s1252_s7 + $0x20] sm:$0xff]   ;;  %v932_v3 = vld [vmem:[%s1252_s7 + $0x18] sm:$0xff]   ;;  %v934_v5 = vld [vmem:[%s1252_s7 + $0x8] sm:$0xff]  }
   0xc   :  { %826 = vmatprep.subr.bf16.mxu0 %v976_v0  ;;  %846 = vmatprep.subr.bf16.mxu1 %v976_v0 }
   0xf   :  { %827 = vmatpush3.bf16.msra.mxu0 %v906_v4  ;;  %847 = vmatpush3.bf16.msra.mxu1 %v915_v13  ;;  %v933_v4 = vld [vmem:[%s1252_s7 + $0x10] sm:$0xff]  }
  0x10   :  { %828 = vmatprep.subr.bf16.mxu0 %v976_v0  ;;  %848 = vmatprep.subr.bf16.mxu1 %v976_v0 }
  0x13   :  { %829 = vmatpush3.bf16.msra.mxu0 %v907_v6  ;;  %849 = vmatpush3.bf16.msra.mxu1 %v916_v14  ;;  %v935_v6 = vld [vmem:[%s1252_s7] sm:$0xff]  }
  0x14   :  { %830 = vmatprep.subr.bf16.mxu0 %v976_v0  ;;  %850 = vmatprep.subr.bf16.mxu1 %v976_v0 }
  0x17   :  { %831 = vmatpush3.bf16.msra.mxu0 %v908_v7  ;;  %851 = vmatpush3.bf16.msra.mxu1 %v917_v15  ;;  %v936_v7 = vld [vmem:[%s1254_s9 + $0x70] ss:$8 sps:$4 sm:$0xff]  }
  0x18   :  { %832 = vmatprep.subr.bf16.mxu0 %v976_v0  ;;  %852 = vmatprep.subr.bf16.mxu1 %v976_v0 }
  0x1b   :  { %833 = vmatpush3.bf16.msra.mxu0 %v909_v8  ;;  %853 = vmatpush3.bf16.msra.mxu1 %v918_v16  ;;  %v938_v8 = vld [vmem:[%s1254_s9 + $0x74] ss:$8 sps:$4 sm:$0xff]  }
  0x1c   :  { %834 = vmatprep.subr.bf16.mxu0 %v976_v0  ;;  %854 = vmatprep.subr.bf16.mxu1 %v976_v0 }
  0x1f   :  { %835 = vmatpush3.bf16.msra.mxu0 %v910_v9  ;;  %855 = vmatpush3.bf16.msra.mxu1 %v919_v17  ;;  %v746_v9 = vld [vmem:[%s1255_s6] ss:$0 sm:$0xff] }
  0x20   :  { %860 = vmatprep.subr.bf16.mxu0 %v976_v0  ;;  %880 = vmatprep.subr.bf16.mxu1 %v976_v0 }
  0x22   :  { %837 = vmatmul.mubr.bf16.vlgmr.msra.gmra.mxu0 %v911_v10 }
  0x23   :  { %876 = vmatprep.mubr.msk.bf16.mxu0 %vm977_vm0, %v976_v0  ;;  %861 = vmatpush3.bf16.msra.mxu0 %v920_v18 }
  0x24   :  { %862 = vmatprep.subr.bf16.mxu0 %v976_v0 }
  0x27   :  { %863 = vmatpush3.bf16.msra.mxu0 %v921_v37  ;;  %v954_v37 = vld [vmem:[%s1254_s9 + $0x10] ss:$8 sps:$4 sm:$0xff]  }
  0x28   :  { %864 = vmatprep.subr.bf16.mxu0 %v976_v0 }
  0x2b   :  { %865 = vmatpush3.bf16.msra.mxu0 %v922_v38  ;;  %v959_v38 = vld [vmem:[%s1254_s9 + $0x4] ss:$8 sps:$4 sm:$0xff]  }
  0x2c   :  { %866 = vmatprep.subr.bf16.mxu0 %v976_v0 }
  0x2f   :  { %867 = vmatpush3.bf16.msra.mxu0 %v923_v39  ;;  %v957_v39 = vld [vmem:[%s1254_s9] ss:$8 sps:$4 sm:$0xff]  }
  0x30   :  { %868 = vmatprep.subr.bf16.mxu0 %v976_v0 }
  0x33   :  { %869 = vmatpush3.bf16.msra.mxu0 %v924_v40  ;;  %v978_v40 = vmov 0  }
  0x34   :  { %870 = vmatprep.subr.bf16.mxu0 %v976_v0 }
  0x37   :  { %871 = vmatpush3.bf16.msra.mxu0 %v925_v41  ;;  %v755_v41 = vld [vmem:[%s1256_s8] ss:$0 sm:$0xff] }
  0x38   :  { %872 = vmatprep.subr.bf16.mxu0 %v976_v0 }
  0x3b   :  { %873 = vmatpush3.bf16.msra.mxu0 %v926_v42 }
  0x3c   :  { %874 = vmatprep.subr.bf16.mxu0 %v976_v0 }
  0x3f   :  { %875 = vmatpush3.bf16.msra.mxu0 %v927_v43 }
  0x40   :  { %666 = vmatprep.subr.bf16.mxu0 %v938_v8 }
  0xe2   :  { %v153_v20 = vpop.f32.mrf.mxu0 }
  0xe3   :  { %v176_v21 = vadd.f32 %v736_v19, %v153_v20 }
  0xe4   :  { %v838_v22 = vpop.f32.mrf.mxu0 }
  0xe5   :  { %v180_v23 = vmul.f32 0.70710677, %v176_v21  ;;  %v178_v31 = vmul.f32 0.5, %v176_v21 }
  0xe6   :  { %v156_v24 = vpop.f32.mrf.mxu0 }
  0xe7   :  { %960 = verf.f32 %v180_v23  ;;  %v177_v25 = vadd.f32 %v736_v19, %v156_v24 }
  0xe8   :  { %v839_v26 = vpop.f32.mrf.mxu0 }
  0xe9   :  { %v181_v27 = vmul.f32 0.70710677, %v177_v25  ;;  %v179_v32 = vmul.f32 0.5, %v177_v25  ;;  %v941_v26 = vld [vmem:[%s1254_s9 + $0x64] ss:$8 sps:$4 sm:$0xff]  }
  0xeb   :  { %962 = verf.f32 %v181_v27  ;;  %v939_v27 = vld [vmem:[%s1254_s9 + $0x60] ss:$8 sps:$4 sm:$0xff]  }
  0xf4   :  { %v961_v28 = vpop.eup %960 }
  0xf5   :  { %v184_v29 = vadd.f32 1.0, %v961_v28  ;;  %v944_v28 = vld [vmem:[%s1254_s9 + $0x54] ss:$8 sps:$4 sm:$0xff]  }
  0xf7   :  { %v186_v34 = vmul.f32 %v184_v29, %v178_v31  ;;  %v942_v29 = vld [vmem:[%s1254_s9 + $0x50] ss:$8 sps:$4 sm:$0xff]   ;;  %v945_v31 = vld [vmem:[%s1254_s9 + $0x40] ss:$8 sps:$4 sm:$0xff]  }
  0xf8   :  { %v963_v30 = vpop.eup %962 }
  0xf9   :  { %v185_v33 = vadd.f32 1.0, %v963_v30  ;;  %v947_v30 = vld [vmem:[%s1254_s9 + $0x44] ss:$8 sps:$4 sm:$0xff]  }
  0xfb   :  { %v187_v35 = vmul.f32 %v185_v33, %v179_v32  ;;  %v950_v32 = vld [vmem:[%s1254_s9 + $0x34] ss:$8 sps:$4 sm:$0xff]   ;;  %v948_v33 = vld [vmem:[%s1254_s9 + $0x30] ss:$8 sps:$4 sm:$0xff]  }
  0xfd   :  { %v205_v36 = vpack.c.bf16 %v187_v35, %v186_v34  ;;  %v953_v34 = vld [vmem:[%s1254_s9 + $0x24] ss:$8 sps:$4 sm:$0xff]   ;;  %v951_v35 = vld [vmem:[%s1254_s9 + $0x20] ss:$8 sps:$4 sm:$0xff]  }
  0xff   :  { %857 = vmatmul.mubr.bf16.vlgmr.msra.gmra.mxu1 %v205_v36  ;;  %v956_v36 = vld [vmem:[%s1254_s9 + $0x14] ss:$8 sps:$4 sm:$0xff]  }
 0x100   :  { %896 = vmatprep.mubr.msk.bf16.mxu1 %vm977_vm0, %v976_v0  ;;  %881 = vmatpush3.bf16.msra.mxu1 %v928_v44 }
 0x101   :  { %882 = vmatprep.subr.bf16.mxu1 %v976_v0 }
 0x104   :  { %883 = vmatpush3.bf16.msra.mxu1 %v929_v63  ;;  %v573_v63 = vld [vmem:[%s1257_s10] sm:$0x3] }
 0x105   :  { %884 = vmatprep.subr.bf16.mxu1 %v976_v0 }
 0x108   :  { %885 = vmatpush3.bf16.msra.mxu1 %v930_v1 }
 0x109   :  { %886 = vmatprep.subr.bf16.mxu1 %v976_v0 }
 0x10c   :  { %887 = vmatpush3.bf16.msra.mxu1 %v931_v2 }
 0x10d   :  { %888 = vmatprep.subr.bf16.mxu1 %v976_v0 }
 0x110   :  { %889 = vmatpush3.bf16.msra.mxu1 %v932_v3 }
 0x111   :  { %890 = vmatprep.subr.bf16.mxu1 %v976_v0 }
 0x114   :  { %891 = vmatpush3.bf16.msra.mxu1 %v933_v4 }
 0x115   :  { %892 = vmatprep.subr.bf16.mxu1 %v976_v0 }
 0x118   :  { %893 = vmatpush3.bf16.msra.mxu1 %v934_v5 }
 0x119   :  { %894 = vmatprep.subr.bf16.mxu1 %v976_v0 }
 0x11c   :  { %895 = vmatpush3.bf16.msra.mxu1 %v935_v6 }
 0x1bf   :  { %v294_v46 = vpop.f32.mrf.mxu1 }
 0x1c0   :  { %v295_v47 = vadd.f32 %v737_v45, %v294_v46 }
 0x1c1   :  { %v858_v48 = vpop.f32.mrf.mxu1 }
 0x1c2   :  { %v303_v49 = vmul.f32 0.70710677, %v295_v47  ;;  %v301_v57 = vmul.f32 0.5, %v295_v47 }
 0x1c3   :  { %v297_v50 = vpop.f32.mrf.mxu1 }
 0x1c4   :  { %964 = verf.f32 %v303_v49  ;;  %v298_v51 = vadd.f32 %v737_v45, %v297_v50 }
 0x1c5   :  { %v859_v52 = vpop.f32.mrf.mxu1 }
 0x1c6   :  { %v304_v53 = vmul.f32 0.70710677, %v298_v51  ;;  %v302_v58 = vmul.f32 0.5, %v298_v51 }
 0x1c8   :  { %966 = verf.f32 %v304_v53 }
 0x1d1   :  { %v965_v54 = vpop.eup %964 }
 0x1d2   :  { %v307_v55 = vadd.f32 1.0, %v965_v54 }
 0x1d4   :  { %v309_v60 = vmul.f32 %v307_v55, %v301_v57 }
 0x1d5   :  { %v967_v56 = vpop.eup %966 }
 0x1d6   :  { %v308_v59 = vadd.f32 1.0, %v967_v56 }
 0x1d8   :  { %v310_v61 = vmul.f32 %v308_v59, %v302_v58  ;;  %v576_v59 = vlaneseq }
 0x1da   :  { %v328_v62 = vpack.c.bf16 %v310_v61, %v309_v60  ;;  %v577_v60 = vshrl.u32 %v576_v59, 7 }
 0x1dc   :  { %877 = vmatmul.mubr.bf16.vlgmr.msra.gmra.mxu0 %v328_v62  ;;  %v578_v61 = vsub.s32 0, %v577_v60  ;;  %v582_v62 = vsub.s32 1, %v577_v60 }
 0x1dd   :  { %667 = vmatpush1.bf16.msra.mxu0 %v936_v7  ;;  %698 = vmatprep.mubr.bf16.mxu0 %v978_v40 }
 0x1de   :  { %668 = vmatprep.subr.bf16.mxu0 %v941_v26  ;;  %v579_v1 = vrot.slane %v573_v63, %v578_v61  ;;  %v583_v2 = vrot.slane %v573_v63, %v582_v62 }
 0x1e1   :  { %669 = vmatpush1.bf16.msra.mxu0 %v939_v27 }
 0x1e2   :  { %670 = vmatprep.subr.bf16.mxu0 %v944_v28 }
 0x1e5   :  { %671 = vmatpush1.bf16.msra.mxu0 %v942_v29 }
 0x1e6   :  { %672 = vmatprep.subr.bf16.mxu0 %v947_v30 }
 0x1e9   :  { %673 = vmatpush1.bf16.msra.mxu0 %v945_v31 }
 0x1ea   :  { %674 = vmatprep.subr.bf16.mxu0 %v950_v32 }
 0x1ed   :  { %675 = vmatpush1.bf16.msra.mxu0 %v948_v33 }
 0x1ee   :  { %676 = vmatprep.subr.bf16.mxu0 %v953_v34 }
 0x1f1   :  { %677 = vmatpush1.bf16.msra.mxu0 %v951_v35 }
 0x1f2   :  { %678 = vmatprep.subr.bf16.mxu0 %v956_v36 }
 0x1f5   :  { %679 = vmatpush1.bf16.msra.mxu0 %v954_v37 }
 0x1f6   :  { %680 = vmatprep.subr.bf16.mxu0 %v959_v38 }
 0x1f9   :  { %681 = vmatpush1.bf16.msra.mxu0 %v957_v39 }
 0x29c   :  { %v417_v0 = vpop.f32.mrf.mxu0 }
 0x29d   :  { %v418_v10 = vadd.f32 %v746_v9, %v417_v0 }
 0x29e   :  { %v878_v11 = vpop.f32.mrf.mxu0 }
 0x29f   :  { %v426_v12 = vmul.f32 0.70710677, %v418_v10  ;;  %v424_v20 = vmul.f32 0.5, %v418_v10 }
 0x2a0   :  { %v420_v13 = vpop.f32.mrf.mxu0 }
 0x2a1   :  { %968 = verf.f32 %v426_v12  ;;  %v421_v14 = vadd.f32 %v746_v9, %v420_v13 }
 0x2a2   :  { %v879_v15 = vpop.f32.mrf.mxu0 }
 0x2a3   :  { %v427_v16 = vmul.f32 0.70710677, %v421_v14  ;;  %v425_v21 = vmul.f32 0.5, %v421_v14 }
 0x2a5   :  { %970 = verf.f32 %v427_v16 }
 0x2ae   :  { %v969_v17 = vpop.eup %968 }
 0x2af   :  { %v430_v18 = vadd.f32 1.0, %v969_v17 }
 0x2b1   :  { %v432_v23 = vmul.f32 %v430_v18, %v424_v20 }
 0x2b2   :  { %v971_v19 = vpop.eup %970 }
 0x2b3   :  { %v431_v22 = vadd.f32 1.0, %v971_v19 }
 0x2b5   :  { %v433_v24 = vmul.f32 %v431_v22, %v425_v21 }
 0x2b7   :  { %v451_v25 = vpack.c.bf16 %v433_v24, %v432_v23 }
 0x2b9   :  { %897 = vmatmul.mubr.bf16.vlgmr.msra.gmra.mxu1 %v451_v25 }
 0x379   :  { %v540_v42 = vpop.f32.mrf.mxu1 }
 0x37a   :  { %v541_v43 = vadd.f32 %v755_v41, %v540_v42 }
 0x37b   :  { %v898_v44 = vpop.f32.mrf.mxu1 }
 0x37c   :  { %v549_v45 = vmul.f32 0.70710677, %v541_v43  ;;  %v547_v53 = vmul.f32 0.5, %v541_v43 }
 0x37d   :  { %v543_v46 = vpop.f32.mrf.mxu1 }
 0x37e   :  { %972 = verf.f32 %v549_v45  ;;  %v544_v47 = vadd.f32 %v755_v41, %v543_v46 }
 0x37f   :  { %v899_v48 = vpop.f32.mrf.mxu1 }
 0x380   :  { %v550_v49 = vmul.f32 0.70710677, %v544_v47  ;;  %v548_v54 = vmul.f32 0.5, %v544_v47 }
 0x382   :  { %974 = verf.f32 %v550_v49 }
 0x38b   :  { %v973_v50 = vpop.eup %972 }
 0x38c   :  { %v553_v51 = vadd.f32 1.0, %v973_v50 }
 0x38e   :  { %v555_v56 = vmul.f32 %v553_v51, %v547_v53 }
 0x38f   :  { %v975_v52 = vpop.eup %974 }
 0x390   :  { %v554_v55 = vadd.f32 1.0, %v975_v52 }
 0x392   :  { %v556_v57 = vmul.f32 %v554_v55, %v548_v54 }
 0x394   :  { %v574_v58 = vpack.c.bf16 %v556_v57, %v555_v56 }
 0x396   :  { %699 = vmatmul.mubr.bf16.vlgmr.msra.gmra.mxu0 %v574_v58 }
 0x456   :  { %v700_v3 = vpop.f32.mrf.mxu0 }
 0x457   :  { %v701_v5 = vadd.f32 %v700_v3, %v579_v1 }
 0x458   :  { %v702_v4 = vpop.f32.mrf.mxu0 }
 0x459   :  { %v703_v6 = vadd.f32 %v702_v4, %v583_v2 }
 0x45a   :  { %v704_v7 = vpop.f32.mrf.mxu0 }
 0x45b   :  { %v782_v8 = vpack.c.bf16 %v703_v6, %v701_v5  ;;  %v705_v0 = vadd.f32 %v704_v7, %v579_v1 }
 0x45c   :  { %v706_v9 = vpop.f32.mrf.mxu0 }
 0x45d   :  { %721 = vst [vmem:[%s1258_s11] sm:$0xff] %v782_v8  ;;  %v707_v10 = vadd.f32 %v706_v9, %v583_v2 }
 0x45f   :  { %v783_v11 = vpack.c.bf16 %v707_v10, %v705_v0 }
 0x461   :  { %722 = vst [vmem:[%s1258_s11 + $0x8] sm:$0xff] %v783_v11 }

</bundles_post_ra>
